<compile_context>
chip_gen: v7x
topology: tpu7x:2x2x1
jax: 0.10.0
libtpu: 0.0.40
codegen_flags: <defaults>
</compile_context>

<pallas_src>
import math
import functools

import jax
import jax.numpy as jnp
from jax.experimental import pallas as pl
from jax.experimental.pallas import tpu as pltpu

# Whole-array VMEM spec — used only for the tiny fused cross-entropy kernel.
VMEM = pl.BlockSpec(memory_space=pltpu.MemorySpace.VMEM)

TM = 512                          # desired activation-row tile
VMEM_LIMIT = 64 * 1024 * 1024     # explicit scoped-VMEM ceiling (fits v7x)


def _tile_m(m, desired=TM, align=16):
    """Largest multiple of `align` <= desired that divides m, else m itself.

    align=16 keeps bf16 blocks at/above the (16, 128) minimum sublane tile;
    small M (pooler / heads / toy shapes) falls back to the full dimension.
    """
    if m <= desired:
        return m
    t = (desired // align) * align
    while t >= align:
        if m % t == 0:
            return t
        t -= align
    return m


# ----------------------------- Pallas kernels -----------------------------

def _matmul_bias_kernel(x_ref, w_ref, b_ref, o_ref, *, act):
    """o = act(x @ w + b); weight fully resident, grid = (M // tm,)."""
    y = jnp.dot(x_ref[...], w_ref[...], preferred_element_type=jnp.float32)
    y = y + b_ref[...]
    if act == 'tanh':
        y = jnp.tanh(y)
    elif act == 'gelu':
        # TODO(synk): HF BERT uses exact erf-GELU; tanh approximation here.
        y = jax.nn.gelu(y, approximate=True)
    o_ref[...] = y.astype(o_ref.dtype)


def _matmul_res_ln_kernel(x_ref, w_ref, b_ref, res_ref, g_ref, bb_ref, o_ref):
    """o = LayerNorm(x @ w + b + res); weight resident, grid = (M // tm,)."""
    y = jnp.dot(x_ref[...], w_ref[...], preferred_element_type=jnp.float32)
    y = y + b_ref[...] + res_ref[...].astype(jnp.float32)
    mu = jnp.mean(y, axis=-1, keepdims=True)
    var = jnp.mean((y - mu) ** 2, axis=-1, keepdims=True)
    inv = jax.lax.rsqrt(var + 1e-12)
    o_ref[...] = ((y - mu) * inv * g_ref[...] + bb_ref[...]).astype(o_ref.dtype)


def _layernorm_kernel(x_ref, g_ref, b_ref, o_ref):
    x = x_ref[...]
    mu = jnp.mean(x, axis=-1, keepdims=True)
    var = jnp.mean((x - mu) ** 2, axis=-1, keepdims=True)
    inv = jax.lax.rsqrt(var + 1e-12)
    o_ref[...] = ((x - mu) * inv * g_ref[...] + b_ref[...]).astype(o_ref.dtype)


def _attention_kernel(qkv_ref, m_ref, o_ref, *, nh, dh):
    """One batch per grid step.

    qkv_ref: (1, S, 3H) bf16, untransposed fused projection output.
    m_ref:   (1, 1, S) additive f32 mask (broadcast over query rows).
    o_ref:   (1, S, H) bf16 context, written head-by-head so the result is
             already in (B, S, H) layout (no XLA transpose afterwards).
    """
    H = nh * dh
    mask = m_ref[0]                                    # (1, S) f32
    scale = 1.0 / math.sqrt(dh)
    for h in range(nh):
        q = qkv_ref[0, :, h * dh:(h + 1) * dh]                     # (S, dh)
        k = qkv_ref[0, :, H + h * dh:H + (h + 1) * dh]
        v = qkv_ref[0, :, 2 * H + h * dh:2 * H + (h + 1) * dh]
        # Fold 1/sqrt(dh) into q (S*dh mults) instead of scaling (S,S) scores.
        q = (q.astype(jnp.float32) * scale).astype(jnp.bfloat16)
        s = jax.lax.dot_general(q, k, (((1,), (1,)), ((), ())),
                                preferred_element_type=jnp.float32)
        s = s + mask                                   # (S,S) + (1,S) broadcast
        mx = jnp.max(s, axis=-1, keepdims=True)
        e = jnp.exp(s - mx)
        denom = jnp.sum(e, axis=-1, keepdims=True)
        p = e * pl.reciprocal(denom, approx=True)      # EUP slot, frees VPU
        ctx = jnp.dot(p.astype(jnp.bfloat16), v,
                      preferred_element_type=jnp.float32)
        o_ref[0, :, h * dh:(h + 1) * dh] = ctx.astype(o_ref.dtype)


def _dual_xent_kernel(logits_ref, sl_ref, il_ref, o_ref, *, c_s, c_i):
    """Summed mean cross-entropy for both heads over padded (B, C_pad) logits."""
    logits = logits_ref[...]                           # (B, C_pad) f32
    B = logits.shape[0]
    cls = jax.lax.broadcasted_iota(jnp.int32, logits.shape, 1)

    def mean_ce(mask, label_cols):
        z = jnp.where(mask, logits, jnp.float32(-1e30))
        m = jnp.max(z, axis=-1, keepdims=True)
        e = jnp.where(mask, jnp.exp(z - m), 0.0)
        lse = jnp.log(jnp.sum(e, axis=-1, keepdims=True)) + m
        onehot = (label_cols == cls).astype(jnp.float32)
        picked = jnp.sum(onehot * logits, axis=-1, keepdims=True)
        per_ex = lse - picked                          # (B, 1)
        return jnp.sum(per_ex, axis=0, keepdims=True) / jnp.float32(B)

    loss_s = mean_ce(cls < c_s, sl_ref[...])
    loss_i = mean_ce((cls >= c_s) & (cls < c_s + c_i), il_ref[...] + c_s)
    o_ref[...] = loss_s + loss_i


# ----------------------------- kernel wrappers -----------------------------

def matmul_bias(x, w, b, act=None, out_dtype=jnp.float32):
    """y = act(x @ w + b); bf16 MXU inputs, f32 accumulation/epilogue."""
    M, K = x.shape
    N = w.shape[1]
    tm = _tile_m(M)
    return pl.pallas_call(
        functools.partial(_matmul_bias_kernel, act=act),
        out_shape=jax.ShapeDtypeStruct((M, N), out_dtype),
        grid_spec=pltpu.PrefetchScalarGridSpec(
            num_scalar_prefetch=0, grid=(M // tm,),
            in_specs=[
                pl.BlockSpec((tm, K), lambda i: (i, 0)),
                pl.BlockSpec((K, N), lambda i: (0, 0)),   # VMEM-resident weight
                pl.BlockSpec((1, N), lambda i: (0, 0)),
            ],
            out_specs=pl.BlockSpec((tm, N), lambda i: (i, 0))),
        compiler_params=pltpu.CompilerParams(
            dimension_semantics=("parallel",),
            vmem_limit_bytes=VMEM_LIMIT),
    )(x.astype(jnp.bfloat16), w.astype(jnp.bfloat16),
      b.reshape(1, N).astype(jnp.float32))


def matmul_res_ln(x, w, b, res, g, beta):
    """y = LayerNorm(x @ w + b + res); bf16 residual stream out."""
    M, K = x.shape
    H = w.shape[1]
    tm = _tile_m(M)
    return pl.pallas_call(
        _matmul_res_ln_kernel,
        out_shape=jax.ShapeDtypeStruct((M, H), jnp.bfloat16),
        grid_spec=pltpu.PrefetchScalarGridSpec(
            num_scalar_prefetch=0, grid=(M // tm,),
            in_specs=[
                pl.BlockSpec((tm, K), lambda i: (i, 0)),
                pl.BlockSpec((K, H), lambda i: (0, 0)),   # VMEM-resident weight
                pl.BlockSpec((1, H), lambda i: (0, 0)),
                pl.BlockSpec((tm, H), lambda i: (i, 0)),  # residual
                pl.BlockSpec((1, H), lambda i: (0, 0)),
                pl.BlockSpec((1, H), lambda i: (0, 0)),
            ],
            out_specs=pl.BlockSpec((tm, H), lambda i: (i, 0))),
        compiler_params=pltpu.CompilerParams(
            dimension_semantics=("parallel",),
            vmem_limit_bytes=VMEM_LIMIT),
    )(x.astype(jnp.bfloat16), w.astype(jnp.bfloat16),
      b.reshape(1, H).astype(jnp.float32),
      res.astype(jnp.bfloat16),
      g.reshape(1, H).astype(jnp.float32),
      beta.reshape(1, H).astype(jnp.float32))


def layernorm(x, g, b):
    M, H = x.shape
    tm = _tile_m(M)
    return pl.pallas_call(
        _layernorm_kernel,
        out_shape=jax.ShapeDtypeStruct((M, H), jnp.bfloat16),
        grid_spec=pltpu.PrefetchScalarGridSpec(
            num_scalar_prefetch=0, grid=(M // tm,),
            in_specs=[
                pl.BlockSpec((tm, H), lambda i: (i, 0)),
                pl.BlockSpec((1, H), lambda i: (0, 0)),
                pl.BlockSpec((1, H), lambda i: (0, 0)),
            ],
            out_specs=pl.BlockSpec((tm, H), lambda i: (i, 0))),
        compiler_params=pltpu.CompilerParams(
            dimension_semantics=("parallel",),
            vmem_limit_bytes=VMEM_LIMIT),
    )(x.astype(jnp.float32), g.reshape(1, H).astype(jnp.float32),
      b.reshape(1, H).astype(jnp.float32))


def attention(qkv, add_mask, nh):
    """qkv: (B, S, 3H) bf16 fused projection; add_mask: (B, 1, S) f32."""
    B, S, H3 = qkv.shape
    H = H3 // 3
    dh = H // nh
    return pl.pallas_call(
        functools.partial(_attention_kernel, nh=nh, dh=dh),
        out_shape=jax.ShapeDtypeStruct((B, S, H), jnp.bfloat16),
        grid_spec=pltpu.PrefetchScalarGridSpec(
            num_scalar_prefetch=0, grid=(B,),
            in_specs=[
                pl.BlockSpec((1, S, H3), lambda b: (b, 0, 0)),
                pl.BlockSpec((1, 1, S), lambda b: (b, 0, 0)),
            ],
            out_specs=pl.BlockSpec((1, S, H), lambda b: (b, 0, 0))),
        compiler_params=pltpu.CompilerParams(
            dimension_semantics=("parallel",),
            vmem_limit_bytes=VMEM_LIMIT),
    )(qkv.astype(jnp.bfloat16), add_mask.astype(jnp.float32))


def dual_cross_entropy(logits_pad, sent_labels, intent_labels, c_s, c_i):
    """Single kernel: mean CE(sentiment) + mean CE(intent) over padded logits."""
    B = logits_pad.shape[0]
    out = pl.pallas_call(
        functools.partial(_dual_xent_kernel, c_s=c_s, c_i=c_i),
        out_shape=jax.ShapeDtypeStruct((1, 1), jnp.float32),
        in_specs=[VMEM, VMEM, VMEM], out_specs=VMEM,
    )(logits_pad.astype(jnp.float32),
      sent_labels.reshape(B, 1).astype(jnp.int32),
      intent_labels.reshape(B, 1).astype(jnp.int32))
    return out[0, 0]


# ----------------------------- model (glue) --------------------------------

def init_params(key, cfg):
    H, I = cfg['hidden'], cfg['intermediate']
    keys = iter(jax.random.split(key, 64 + 16 * cfg['layers']))

    def w(shape, dtype=jnp.bfloat16):
        # Matmul weights are stored in bf16 once (no per-call cast, half the
        # steady-state weight DMA); embeddings / LN params stay f32.
        return (jax.random.normal(next(keys), shape, jnp.float32) * 0.02
                ).astype(dtype)

    p = {
        'word_emb': w((cfg['vocab'], H), jnp.float32),
        'pos_emb':  w((cfg['max_pos'], H), jnp.float32),
        'type_emb': w((2, H), jnp.float32),
        'emb_ln_g': jnp.ones((H,), jnp.float32),
        'emb_ln_b': jnp.zeros((H,), jnp.float32),
        'layers': [],
    }
    for _ in range(cfg['layers']):
        p['layers'].append({
            # fused Q|K|V projection
            'wqkv': w((H, 3 * H)), 'bqkv': jnp.zeros((3 * H,), jnp.float32),
            'wo': w((H, H)), 'bo': jnp.zeros((H,), jnp.float32),
            'ln1_g': jnp.ones((H,), jnp.float32),
            'ln1_b': jnp.zeros((H,), jnp.float32),
            'w1': w((H, I)), 'b1': jnp.zeros((I,), jnp.float32),
            'w2': w((I, H)), 'b2': jnp.zeros((H,), jnp.float32),
            'ln2_g': jnp.ones((H,), jnp.float32),
            'ln2_b': jnp.zeros((H,), jnp.float32),
        })
    p['pooler_w'] = w((H, H))
    p['pooler_b'] = jnp.zeros((H,), jnp.float32)

    # Fused, lane-padded classifier heads: [sentiment | intent | zero pad].
    c_s, c_i = cfg['num_sentiment'], cfg['num_intent']
    c_pad = max(128, ((c_s + c_i + 127) // 128) * 128)
    head_w = jnp.concatenate([w((H, c_s), jnp.float32),
                              w((H, c_i), jnp.float32)], axis=1)
    p['head_w'] = jnp.pad(head_w, ((0, 0), (0, c_pad - c_s - c_i))
                          ).astype(jnp.bfloat16)
    p['head_b'] = jnp.zeros((c_pad,), jnp.float32)
    return p


def bert_layer(lp, x, add_mask, B, S, cfg):
    H = cfg['hidden']
    nh = cfg['heads']

    # Fused QKV projection, bf16 out (feeds the attention matmuls directly).
    qkv = matmul_bias(x, lp['wqkv'], lp['bqkv'], out_dtype=jnp.bfloat16)
    qkv = qkv.reshape(B, S, 3 * H)                 # free reshape, no transpose

    ctx = attention(qkv, add_mask, nh)             # (B, S, H) bf16
    ctx = ctx.reshape(B * S, H)                    # free reshape

    # Output projection with fused bias + residual + LayerNorm epilogue.
    x = matmul_res_ln(ctx, lp['wo'], lp['bo'], x, lp['ln1_g'], lp['ln1_b'])

    # FFN: matmul + bias + GELU (bf16 out), then matmul + bias + residual + LN.
    h = matmul_bias(x, lp['w1'], lp['b1'], act='gelu', out_dtype=jnp.bfloat16)
    x = matmul_res_ln(h, lp['w2'], lp['b2'], x, lp['ln2_g'], lp['ln2_b'])
    return x


def bert_forward(params, input_ids, attention_mask, cfg):
    B, S = input_ids.shape
    H = cfg['hidden']

    # TODO(synk): token_type_ids hard-coded to zeros (matches the default call).
    emb = (jnp.take(params['word_emb'], input_ids, axis=0)
           + params['pos_emb'][None, :S, :]
           + params['type_emb'][0][None, None, :])
    x = layernorm(emb.reshape(B * S, H),
                  params['emb_ln_g'], params['emb_ln_b'])       # (B*S,H) bf16

    # Tiny (B,1,S) additive mask; broadcast happens inside the attention kernel.
    add_mask = ((1.0 - attention_mask.astype(jnp.float32)) * -1e9
                ).reshape(B, 1, S)

    for lp in params['layers']:
        x = bert_layer(lp, x, add_mask, B, S, cfg)

    seq_out = x.reshape(B, S, H)                                 # bf16
    cls_tok = seq_out[:, 0, :]                                   # (B, H)
    pooled = matmul_bias(cls_tok, params['pooler_w'], params['pooler_b'],
                         act='tanh', out_dtype=jnp.bfloat16)
    return seq_out, pooled


def multi_task_bert_forward(params, input_ids, attention_mask, labels,
                            intent_labels, cfg):
    _, pooled = bert_forward(params, input_ids, attention_mask, cfg)

    # Both heads in one lane-dense padded matmul, then slice the logits.
    c_s, c_i = cfg['num_sentiment'], cfg['num_intent']
    logits_all = matmul_bias(pooled, params['head_w'], params['head_b'],
                             out_dtype=jnp.float32)
    sentiment_logits = logits_all[:, :c_s]
    intent_logits = logits_all[:, c_s:c_s + c_i]

    loss = None
    if labels is not None and intent_labels is not None:
        loss = dual_cross_entropy(logits_all, labels, intent_labels, c_s, c_i)
    return {'loss': loss,
            'sentiment_logits': sentiment_logits,
            'intent_logits': intent_logits}


# --------------------------------- main -------------------------------------

if __name__ == "__main__":
    cfg = dict(hidden=32, heads=2, layers=2, intermediate=64, vocab=100,
               max_pos=16, num_sentiment=3, num_intent=5)

    root = jax.random.PRNGKey(0)
    kparam, kid, klab, kint = jax.random.split(root, 4)
    params = init_params(kparam, cfg)

    B, S = 2, 8
    input_ids = jax.random.randint(kid, (B, S), 0, cfg['vocab'], dtype=jnp.int32)
    attention_mask = jnp.ones((B, S), dtype=jnp.int32).at[1, 6:].set(0)
    labels = jax.random.randint(klab, (B,), 0, cfg['num_sentiment'],
                                dtype=jnp.int32)
    intent_labels = jax.random.randint(kint, (B,), 0, cfg['num_intent'],
                                       dtype=jnp.int32)

    fwd = jax.jit(lambda p, ii, am, lb, il:
                  multi_task_bert_forward(p, ii, am, lb, il, cfg))
    out = fwd(params, input_ids, attention_mask, labels, intent_labels)
    jax.block_until_ready((out['loss'],
                           out['sentiment_logits'],
                           out['intent_logits']))
    print("KERNEL_OK")
</pallas_src>

<mosaic_0001>
module attributes {stable_mosaic.version = 11 : i64} {
  func.func @_matmul_bias_kernel(%arg0: i32, %arg1: memref<16x32xbf16, #tpu.memory_space<vmem>>, %arg2: memref<32x96xbf16, #tpu.memory_space<vmem>>, %arg3: memref<1x96xf32, #tpu.memory_space<vmem>>, %arg4: memref<16x96xbf16, #tpu.memory_space<vmem>>) attributes {dimension_semantics = [#tpu.dimension_semantics<parallel>], iteration_bounds = array<i64: 1>, scalar_prefetch = 0 : i64, scratch_operands = 0 : i64, tpu.core_type = #tpu.core_type<tc>, window_params = [{transform_indices = @transform_0, window_bounds = array<i64: 16, 32>}, {pipeline_mode = #tpu.pipeline_mode<synchronous>, transform_indices = @transform_1, window_bounds = array<i64: 32, 96>}, {pipeline_mode = #tpu.pipeline_mode<synchronous>, transform_indices = @transform_2, window_bounds = array<i64: 1, 96>}, {transform_indices = @transform_3, window_bounds = array<i64: 16, 96>}]} {
    %c0 = arith.constant 0 : index
    %c0_0 = arith.constant 0 : index
    %0 = vector.load %arg1[%c0, %c0_0] : memref<16x32xbf16, #tpu.memory_space<vmem>>, vector<16x32xbf16>
    %c0_1 = arith.constant 0 : index
    %c0_2 = arith.constant 0 : index
    %1 = vector.load %arg2[%c0_1, %c0_2] : memref<32x96xbf16, #tpu.memory_space<vmem>>, vector<32x96xbf16>
    %cst = arith.constant dense<0.000000e+00> : vector<16x96xf32>
    %2 = tpu.matmul %0, %1, %cst {dimension_numbers = #tpu.dot_dimension_numbers<[1], [0], [0], [1], [0, 0, 1, 1], [], []>} : vector<16x32xbf16>, vector<32x96xbf16>, vector<16x96xf32> -> vector<16x96xf32>
    %c0_3 = arith.constant 0 : index
    %c0_4 = arith.constant 0 : index
    %3 = vector.load %arg3[%c0_3, %c0_4] : memref<1x96xf32, #tpu.memory_space<vmem>>, vector<1x96xf32>
    %4 = vector.broadcast %3 : vector<1x96xf32> to vector<16x96xf32>
    %5 = arith.addf %2, %4 : vector<16x96xf32>
    %6 = arith.truncf %5 : vector<16x96xf32> to vector<16x96xbf16>
    %c0_5 = arith.constant 0 : index
    %c0_6 = arith.constant 0 : index
    %7 = vector.load %arg4[%c0_5, %c0_6] : memref<16x96xbf16, #tpu.memory_space<vmem>>, vector<16x96xbf16>
    tpu.vector_store %arg4[%c0_5, %c0_6], %6 {strides = array<i32>} : memref<16x96xbf16, #tpu.memory_space<vmem>>, vector<16x96xbf16>,
    return
  }
  func.func @transform_0(%arg0: i32) -> (i32, i32) {
    %c0_i32 = arith.constant 0 : i32
    %c0_i32_0 = arith.constant 0 : i32
    return %arg0, %c0_i32 : i32, i32
  }
  func.func @transform_1(%arg0: i32) -> (i32, i32) {
    %c0_i32 = arith.constant 0 : i32
    %c0_i32_0 = arith.constant 0 : i32
    %c0_i32_1 = arith.constant 0 : i32
    return %c0_i32, %c0_i32_0 : i32, i32
  }
  func.func @transform_2(%arg0: i32) -> (i32, i32) {
    %c0_i32 = arith.constant 0 : i32
    %c0_i32_0 = arith.constant 0 : i32
    %c0_i32_1 = arith.constant 0 : i32
    return %c0_i32, %c0_i32_0 : i32, i32
  }
  func.func @transform_3(%arg0: i32) -> (i32, i32) {
    %c0_i32 = arith.constant 0 : i32
    %c0_i32_0 = arith.constant 0 : i32
    return %arg0, %c0_i32 : i32, i32
  }
}

module attributes {stable_mosaic.version = 11 : i64} {
  func.func @_attention_kernel(%arg0: i32, %arg1: memref<1x8x96xbf16, #tpu.memory_space<vmem>>, %arg2: memref<1x1x8xf32, #tpu.memory_space<vmem>>, %arg3: memref<1x8x32xbf16, #tpu.memory_space<vmem>>) attributes {dimension_semantics = [#tpu.dimension_semantics<parallel>], iteration_bounds = array<i64: 2>, scalar_prefetch = 0 : i64, scratch_operands = 0 : i64, tpu.core_type = #tpu.core_type<tc>, window_params = [{transform_indices = @transform_0, window_bounds = array<i64: 1, 8, 96>}, {transform_indices = @transform_1, window_bounds = array<i64: 1, 1, 8>}, {transform_indices = @transform_2, window_bounds = array<i64: 1, 8, 32>}]} {
    %c0 = arith.constant 0 : index
    %c0_0 = arith.constant 0 : index
    %c0_1 = arith.constant 0 : index
    %0 = vector.load %arg2[%c0, %c0_0, %c0_1] : memref<1x1x8xf32, #tpu.memory_space<vmem>>, vector<1x1x8xf32>
    %1 = vector.shape_cast %0 : vector<1x1x8xf32> to vector<1x8xf32>
    %c0_2 = arith.constant 0 : index
    %c0_3 = arith.constant 0 : index
    %c0_4 = arith.constant 0 : index
    %2 = vector.load %arg1[%c0_2, %c0_3, %c0_4] : memref<1x8x96xbf16, #tpu.memory_space<vmem>>, vector<1x8x16xbf16>
    %3 = vector.shape_cast %2 : vector<1x8x16xbf16> to vector<8x16xbf16>
    %c0_5 = arith.constant 0 : index
    %c0_6 = arith.constant 0 : index
    %c32 = arith.constant 32 : index
    %4 = vector.load %arg1[%c0_5, %c0_6, %c32] : memref<1x8x96xbf16, #tpu.memory_space<vmem>>, vector<1x8x16xbf16>
    %5 = vector.shape_cast %4 : vector<1x8x16xbf16> to vector<8x16xbf16>
    %c0_7 = arith.constant 0 : index
    %c0_8 = arith.constant 0 : index
    %c64 = arith.constant 64 : index
    %6 = vector.load %arg1[%c0_7, %c0_8, %c64] : memref<1x8x96xbf16, #tpu.memory_space<vmem>>, vector<1x8x16xbf16>
    %7 = vector.shape_cast %6 : vector<1x8x16xbf16> to vector<8x16xbf16>
    %8 = arith.extf %3 : vector<8x16xbf16> to vector<8x16xf32>
    %cst = arith.constant 2.500000e-01 : f32
    %9 = vector.broadcast %cst : f32 to vector<8x16xf32>
    %10 = arith.mulf %8, %9 : vector<8x16xf32>
    %11 = arith.truncf %10 : vector<8x16xf32> to vector<8x16xbf16>
    %cst_9 = arith.constant dense<0.000000e+00> : vector<8x8xf32>
    %12 = tpu.matmul %11, %5, %cst_9 {dimension_numbers = #tpu.dot_dimension_numbers<[1], [1], [0], [0], [0, 0, 1, 0], [], []>} : vector<8x16xbf16>, vector<8x16xbf16>, vector<8x8xf32> -> vector<8x8xf32>
    %13 = vector.broadcast %1 : vector<1x8xf32> to vector<8x8xf32>
    %14 = arith.addf %12, %13 : vector<8x8xf32>
    %cst_10 = arith.constant dense<0xFF800000> : vector<8xf32>
    %15 = vector.multi_reduction <maximumf>, %14, %cst_10 [1] : vector<8x8xf32> to vector<8xf32>
    %16 = vector.shape_cast %15 : vector<8xf32> to vector<8x1xf32>
    %17 = vector.broadcast %16 : vector<8x1xf32> to vector<8x8xf32>
    %18 = arith.subf %14, %17 : vector<8x8xf32>
    %19 = math.exp %18 : vector<8x8xf32>
    %cst_11 = arith.constant dense<0.000000e+00> : vector<8xf32>
    %20 = vector.multi_reduction <add>, %19, %cst_11 [1] : vector<8x8xf32> to vector<8xf32>
    %21 = vector.shape_cast %20 : vector<8xf32> to vector<8x1xf32>
    %22 = tpu.reciprocal %21 {approx = true} : vector<8x1xf32> -> vector<8x1xf32>
    %23 = vector.broadcast %22 : vector<8x1xf32> to vector<8x8xf32>
    %24 = arith.mulf %19, %23 : vector<8x8xf32>
    %25 = arith.truncf %24 : vector<8x8xf32> to vector<8x8xbf16>
    %cst_12 = arith.constant dense<0.000000e+00> : vector<8x16xf32>
    %26 = tpu.matmul %25, %7, %cst_12 {dimension_numbers = #tpu.dot_dimension_numbers<[1], [0], [0], [1], [0, 0, 1, 1], [], []>} : vector<8x8xbf16>, vector<8x16xbf16>, vector<8x16xf32> -> vector<8x16xf32>
    %27 = arith.truncf %26 : vector<8x16xf32> to vector<8x16xbf16>
    %c0_13 = arith.constant 0 : index
    %c0_14 = arith.constant 0 : index
    %c0_15 = arith.constant 0 : index
    %28 = vector.load %arg3[%c0_13, %c0_14, %c0_15] : memref<1x8x32xbf16, #tpu.memory_space<vmem>>, vector<1x8x16xbf16>
    %29 = vector.shape_cast %28 : vector<1x8x16xbf16> to vector<8x16xbf16>
    %30 = vector.shape_cast %27 : vector<8x16xbf16> to vector<1x8x16xbf16>
    tpu.vector_store %arg3[%c0_13, %c0_14, %c0_15], %30 {strides = array<i32>} : memref<1x8x32xbf16, #tpu.memory_space<vmem>>, vector<1x8x16xbf16>,
    %c0_16 = arith.constant 0 : index
    %c0_17 = arith.constant 0 : index
    %c16 = arith.constant 16 : index
    %31 = vector.load %arg1[%c0_16, %c0_17, %c16] : memref<1x8x96xbf16, #tpu.memory_space<vmem>>, vector<1x8x16xbf16>
    %32 = vector.shape_cast %31 : vector<1x8x16xbf16> to vector<8x16xbf16>
    %c0_18 = arith.constant 0 : index
    %c0_19 = arith.constant 0 : index
    %c48 = arith.constant 48 : index
    %33 = vector.load %arg1[%c0_18, %c0_19, %c48] : memref<1x8x96xbf16, #tpu.memory_space<vmem>>, vector<1x8x16xbf16>
    %34 = vector.shape_cast %33 : vector<1x8x16xbf16> to vector<8x16xbf16>
    %c0_20 = arith.constant 0 : index
    %c0_21 = arith.constant 0 : index
    %c80 = arith.constant 80 : index
    %35 = vector.load %arg1[%c0_20, %c0_21, %c80] : memref<1x8x96xbf16, #tpu.memory_space<vmem>>, vector<1x8x16xbf16>
    %36 = vector.shape_cast %35 : vector<1x8x16xbf16> to vector<8x16xbf16>
    %37 = arith.extf %32 : vector<8x16xbf16> to vector<8x16xf32>
    %cst_22 = arith.constant 2.500000e-01 : f32
    %38 = vector.broadcast %cst_22 : f32 to vector<8x16xf32>
    %39 = arith.mulf %37, %38 : vector<8x16xf32>
    %40 = arith.truncf %39 : vector<8x16xf32> to vector<8x16xbf16>
    %cst_23 = arith.constant dense<0.000000e+00> : vector<8x8xf32>
    %41 = tpu.matmul %40, %34, %cst_23 {dimension_numbers = #tpu.dot_dimension_numbers<[1], [1], [0], [0], [0, 0, 1, 0], [], []>} : vector<8x16xbf16>, vector<8x16xbf16>, vector<8x8xf32> -> vector<8x8xf32>
    %42 = vector.broadcast %1 : vector<1x8xf32> to vector<8x8xf32>
    %43 = arith.addf %41, %42 : vector<8x8xf32>
    %cst_24 = arith.constant dense<0xFF800000> : vector<8xf32>
    %44 = vector.multi_reduction <maximumf>, %43, %cst_24 [1] : vector<8x8xf32> to vector<8xf32>
    %45 = vector.shape_cast %44 : vector<8xf32> to vector<8x1xf32>
    %46 = vector.broadcast %45 : vector<8x1xf32> to vector<8x8xf32>
    %47 = arith.subf %43, %46 : vector<8x8xf32>
    %48 = math.exp %47 : vector<8x8xf32>
    %cst_25 = arith.constant dense<0.000000e+00> : vector<8xf32>
    %49 = vector.multi_reduction <add>, %48, %cst_25 [1] : vector<8x8xf32> to vector<8xf32>
    %50 = vector.shape_cast %49 : vector<8xf32> to vector<8x1xf32>
    %51 = tpu.reciprocal %50 {approx = true} : vector<8x1xf32> -> vector<8x1xf32>
    %52 = vector.broadcast %51 : vector<8x1xf32> to vector<8x8xf32>
    %53 = arith.mulf %48, %52 : vector<8x8xf32>
    %54 = arith.truncf %53 : vector<8x8xf32> to vector<8x8xbf16>
    %cst_26 = arith.constant dense<0.000000e+00> : vector<8x16xf32>
    %55 = tpu.matmul %54, %36, %cst_26 {dimension_numbers = #tpu.dot_dimension_numbers<[1], [0], [0], [1], [0, 0, 1, 1], [], []>} : vector<8x8xbf16>, vector<8x16xbf16>, vector<8x16xf32> -> vector<8x16xf32>
    %56 = arith.truncf %55 : vector<8x16xf32> to vector<8x16xbf16>
    %c0_27 = arith.constant 0 : index
    %c0_28 = arith.constant 0 : index
    %c16_29 = arith.constant 16 : index
    %57 = vector.load %arg3[%c0_27, %c0_28, %c16_29] : memref<1x8x32xbf16, #tpu.memory_space<vmem>>, vector<1x8x16xbf16>
    %58 = vector.shape_cast %57 : vector<1x8x16xbf16> to vector<8x16xbf16>
    %59 = vector.shape_cast %56 : vector<8x16xbf16> to vector<1x8x16xbf16>
    tpu.vector_store %arg3[%c0_27, %c0_28, %c16_29], %59 {strides = array<i32>} : memref<1x8x32xbf16, #tpu.memory_space<vmem>>, vector<1x8x16xbf16>,
    return
  }
  func.func @transform_0(%arg0: i32) -> (i32, i32, i32) {
    %c0_i32 = arith.constant 0 : i32
    %c0_i32_0 = arith.constant 0 : i32
    %c0_i32_1 = arith.constant 0 : i32
    return %arg0, %c0_i32, %c0_i32_0 : i32, i32, i32
  }
  func.func @transform_1(%arg0: i32) -> (i32, i32, i32) {
    %c0_i32 = arith.constant 0 : i32
    %c0_i32_0 = arith.constant 0 : i32
    %c0_i32_1 = arith.constant 0 : i32
    return %arg0, %c0_i32, %c0_i32_0 : i32, i32, i32
  }
  func.func @transform_2(%arg0: i32) -> (i32, i32, i32) {
    %c0_i32 = arith.constant 0 : i32
    %c0_i32_0 = arith.constant 0 : i32
    %c0_i32_1 = arith.constant 0 : i32
    return %arg0, %c0_i32, %c0_i32_0 : i32, i32, i32
  }
}

module attributes {stable_mosaic.version = 11 : i64} {
  func.func @_layernorm_kernel(%arg0: i32, %arg1: memref<16x32xf32, #tpu.memory_space<vmem>>, %arg2: memref<1x32xf32, #tpu.memory_space<vmem>>, %arg3: memref<1x32xf32, #tpu.memory_space<vmem>>, %arg4: memref<16x32xbf16, #tpu.memory_space<vmem>>) attributes {dimension_semantics = [#tpu.dimension_semantics<parallel>], iteration_bounds = array<i64: 1>, scalar_prefetch = 0 : i64, scratch_operands = 0 : i64, tpu.core_type = #tpu.core_type<tc>, window_params = [{transform_indices = @transform_0, window_bounds = array<i64: 16, 32>}, {pipeline_mode = #tpu.pipeline_mode<synchronous>, transform_indices = @transform_1, window_bounds = array<i64: 1, 32>}, {pipeline_mode = #tpu.pipeline_mode<synchronous>, transform_indices = @transform_2, window_bounds = array<i64: 1, 32>}, {transform_indices = @transform_3, window_bounds = array<i64: 16, 32>}]} {
    %c0 = arith.constant 0 : index
    %c0_0 = arith.constant 0 : index
    %0 = vector.load %arg1[%c0, %c0_0] : memref<16x32xf32, #tpu.memory_space<vmem>>, vector<16x32xf32>
    %cst = arith.constant dense<0.000000e+00> : vector<16xf32>
    %1 = vector.multi_reduction <add>, %0, %cst [1] : vector<16x32xf32> to vector<16xf32>
    %2 = vector.shape_cast %1 : vector<16xf32> to vector<16x1xf32>
    %cst_1 = arith.constant 3.200000e+01 : f32
    %3 = vector.broadcast %cst_1 : f32 to vector<16x1xf32>
    %4 = arith.divf %2, %3 : vector<16x1xf32>
    %5 = vector.broadcast %4 : vector<16x1xf32> to vector<16x32xf32>
    %6 = arith.subf %0, %5 : vector<16x32xf32>
    %7 = arith.mulf %6, %6 : vector<16x32xf32>
    %cst_2 = arith.constant dense<0.000000e+00> : vector<16xf32>
    %8 = vector.multi_reduction <add>, %7, %cst_2 [1] : vector<16x32xf32> to vector<16xf32>
    %9 = vector.shape_cast %8 : vector<16xf32> to vector<16x1xf32>
    %cst_3 = arith.constant 3.200000e+01 : f32
    %10 = vector.broadcast %cst_3 : f32 to vector<16x1xf32>
    %11 = arith.divf %9, %10 : vector<16x1xf32>
    %cst_4 = arith.constant 9.99999996E-13 : f32
    %12 = vector.broadcast %cst_4 : f32 to vector<16x1xf32>
    %13 = arith.addf %11, %12 : vector<16x1xf32>
    %14 = math.rsqrt %13 : vector<16x1xf32>
    %15 = vector.broadcast %4 : vector<16x1xf32> to vector<16x32xf32>
    %16 = arith.subf %0, %15 : vector<16x32xf32>
    %17 = vector.broadcast %14 : vector<16x1xf32> to vector<16x32xf32>
    %18 = arith.mulf %16, %17 : vector<16x32xf32>
    %c0_5 = arith.constant 0 : index
    %c0_6 = arith.constant 0 : index
    %19 = vector.load %arg2[%c0_5, %c0_6] : memref<1x32xf32, #tpu.memory_space<vmem>>, vector<1x32xf32>
    %20 = vector.broadcast %19 : vector<1x32xf32> to vector<16x32xf32>
    %21 = arith.mulf %18, %20 : vector<16x32xf32>
    %c0_7 = arith.constant 0 : index
    %c0_8 = arith.constant 0 : index
    %22 = vector.load %arg3[%c0_7, %c0_8] : memref<1x32xf32, #tpu.memory_space<vmem>>, vector<1x32xf32>
    %23 = vector.broadcast %22 : vector<1x32xf32> to vector<16x32xf32>
    %24 = arith.addf %21, %23 : vector<16x32xf32>
    %25 = arith.truncf %24 : vector<16x32xf32> to vector<16x32xbf16>
    %c0_9 = arith.constant 0 : index
    %c0_10 = arith.constant 0 : index
    %26 = vector.load %arg4[%c0_9, %c0_10] : memref<16x32xbf16, #tpu.memory_space<vmem>>, vector<16x32xbf16>
    tpu.vector_store %arg4[%c0_9, %c0_10], %25 {strides = array<i32>} : memref<16x32xbf16, #tpu.memory_space<vmem>>, vector<16x32xbf16>,
    return
  }
  func.func @transform_0(%arg0: i32) -> (i32, i32) {
    %c0_i32 = arith.constant 0 : i32
    %c0_i32_0 = arith.constant 0 : i32
    return %arg0, %c0_i32 : i32, i32
  }
  func.func @transform_1(%arg0: i32) -> (i32, i32) {
    %c0_i32 = arith.constant 0 : i32
    %c0_i32_0 = arith.constant 0 : i32
    %c0_i32_1 = arith.constant 0 : i32
    return %c0_i32, %c0_i32_0 : i32, i32
  }
  func.func @transform_2(%arg0: i32) -> (i32, i32) {
    %c0_i32 = arith.constant 0 : i32
    %c0_i32_0 = arith.constant 0 : i32
    %c0_i32_1 = arith.constant 0 : i32
    return %c0_i32, %c0_i32_0 : i32, i32
  }
  func.func @transform_3(%arg0: i32) -> (i32, i32) {
    %c0_i32 = arith.constant 0 : i32
    %c0_i32_0 = arith.constant 0 : i32
    return %arg0, %c0_i32 : i32, i32
  }
}

module attributes {stable_mosaic.version = 11 : i64} {
  func.func @_matmul_res_ln_kernel(%arg0: i32, %arg1: memref<16x32xbf16, #tpu.memory_space<vmem>>, %arg2: memref<32x32xbf16, #tpu.memory_space<vmem>>, %arg3: memref<1x32xf32, #tpu.memory_space<vmem>>, %arg4: memref<16x32xbf16, #tpu.memory_space<vmem>>, %arg5: memref<1x32xf32, #tpu.memory_space<vmem>>, %arg6: memref<1x32xf32, #tpu.memory_space<vmem>>, %arg7: memref<16x32xbf16, #tpu.memory_space<vmem>>) attributes {dimension_semantics = [#tpu.dimension_semantics<parallel>], iteration_bounds = array<i64: 1>, scalar_prefetch = 0 : i64, scratch_operands = 0 : i64, tpu.core_type = #tpu.core_type<tc>, window_params = [{transform_indices = @transform_0, window_bounds = array<i64: 16, 32>}, {pipeline_mode = #tpu.pipeline_mode<synchronous>, transform_indices = @transform_1, window_bounds = array<i64: 32, 32>}, {pipeline_mode = #tpu.pipeline_mode<synchronous>, transform_indices = @transform_2, window_bounds = array<i64: 1, 32>}, {transform_indices = @transform_3, window_bounds = array<i64: 16, 32>}, {pipeline_mode = #tpu.pipeline_mode<synchronous>, transform_indices = @transform_4, window_bounds = array<i64: 1, 32>}, {pipeline_mode = #tpu.pipeline_mode<synchronous>, transform_indices = @transform_5, window_bounds = array<i64: 1, 32>}, {transform_indices = @transform_6, window_bounds = array<i64: 16, 32>}]} {
    %c0 = arith.constant 0 : index
    %c0_0 = arith.constant 0 : index
    %0 = vector.load %arg1[%c0, %c0_0] : memref<16x32xbf16, #tpu.memory_space<vmem>>, vector<16x32xbf16>
    %c0_1 = arith.constant 0 : index
    %c0_2 = arith.constant 0 : index
    %1 = vector.load %arg2[%c0_1, %c0_2] : memref<32x32xbf16, #tpu.memory_space<vmem>>, vector<32x32xbf16>
    %cst = arith.constant dense<0.000000e+00> : vector<16x32xf32>
    %2 = tpu.matmul %0, %1, %cst {dimension_numbers = #tpu.dot_dimension_numbers<[1], [0], [0], [1], [0, 0, 1, 1], [], []>} : vector<16x32xbf16>, vector<32x32xbf16>, vector<16x32xf32> -> vector<16x32xf32>
    %c0_3 = arith.constant 0 : index
    %c0_4 = arith.constant 0 : index
    %3 = vector.load %arg3[%c0_3, %c0_4] : memref<1x32xf32, #tpu.memory_space<vmem>>, vector<1x32xf32>
    %4 = vector.broadcast %3 : vector<1x32xf32> to vector<16x32xf32>
    %5 = arith.addf %2, %4 : vector<16x32xf32>
    %c0_5 = arith.constant 0 : index
    %c0_6 = arith.constant 0 : index
    %6 = vector.load %arg4[%c0_5, %c0_6] : memref<16x32xbf16, #tpu.memory_space<vmem>>, vector<16x32xbf16>
    %7 = arith.extf %6 : vector<16x32xbf16> to vector<16x32xf32>
    %8 = arith.addf %5, %7 : vector<16x32xf32>
    %cst_7 = arith.constant dense<0.000000e+00> : vector<16xf32>
    %9 = vector.multi_reduction <add>, %8, %cst_7 [1] : vector<16x32xf32> to vector<16xf32>
    %10 = vector.shape_cast %9 : vector<16xf32> to vector<16x1xf32>
    %cst_8 = arith.constant 3.200000e+01 : f32
    %11 = vector.broadcast %cst_8 : f32 to vector<16x1xf32>
    %12 = arith.divf %10, %11 : vector<16x1xf32>
    %13 = vector.broadcast %12 : vector<16x1xf32> to vector<16x32xf32>
    %14 = arith.subf %8, %13 : vector<16x32xf32>
    %15 = arith.mulf %14, %14 : vector<16x32xf32>
    %cst_9 = arith.constant dense<0.000000e+00> : vector<16xf32>
    %16 = vector.multi_reduction <add>, %15, %cst_9 [1] : vector<16x32xf32> to vector<16xf32>
    %17 = vector.shape_cast %16 : vector<16xf32> to vector<16x1xf32>
    %cst_10 = arith.constant 3.200000e+01 : f32
    %18 = vector.broadcast %cst_10 : f32 to vector<16x1xf32>
    %19 = arith.divf %17, %18 : vector<16x1xf32>
    %cst_11 = arith.constant 9.99999996E-13 : f32
    %20 = vector.broadcast %cst_11 : f32 to vector<16x1xf32>
    %21 = arith.addf %19, %20 : vector<16x1xf32>
    %22 = math.rsqrt %21 : vector<16x1xf32>
    %23 = vector.broadcast %12 : vector<16x1xf32> to vector<16x32xf32>
    %24 = arith.subf %8, %23 : vector<16x32xf32>
    %25 = vector.broadcast %22 : vector<16x1xf32> to vector<16x32xf32>
    %26 = arith.mulf %24, %25 : vector<16x32xf32>
    %c0_12 = arith.constant 0 : index
    %c0_13 = arith.constant 0 : index
    %27 = vector.load %arg5[%c0_12, %c0_13] : memref<1x32xf32, #tpu.memory_space<vmem>>, vector<1x32xf32>
    %28 = vector.broadcast %27 : vector<1x32xf32> to vector<16x32xf32>
    %29 = arith.mulf %26, %28 : vector<16x32xf32>
    %c0_14 = arith.constant 0 : index
    %c0_15 = arith.constant 0 : index
    %30 = vector.load %arg6[%c0_14, %c0_15] : memref<1x32xf32, #tpu.memory_space<vmem>>, vector<1x32xf32>
    %31 = vector.broadcast %30 : vector<1x32xf32> to vector<16x32xf32>
    %32 = arith.addf %29, %31 : vector<16x32xf32>
    %33 = arith.truncf %32 : vector<16x32xf32> to vector<16x32xbf16>
    %c0_16 = arith.constant 0 : index
    %c0_17 = arith.constant 0 : index
    %34 = vector.load %arg7[%c0_16, %c0_17] : memref<16x32xbf16, #tpu.memory_space<vmem>>, vector<16x32xbf16>
    tpu.vector_store %arg7[%c0_16, %c0_17], %33 {strides = array<i32>} : memref<16x32xbf16, #tpu.memory_space<vmem>>, vector<16x32xbf16>,
    return
  }
  func.func @transform_0(%arg0: i32) -> (i32, i32) {
    %c0_i32 = arith.constant 0 : i32
    %c0_i32_0 = arith.constant 0 : i32
    return %arg0, %c0_i32 : i32, i32
  }
  func.func @transform_1(%arg0: i32) -> (i32, i32) {
    %c0_i32 = arith.constant 0 : i32
    %c0_i32_0 = arith.constant 0 : i32
    %c0_i32_1 = arith.constant 0 : i32
    return %c0_i32, %c0_i32_0 : i32, i32
  }
  func.func @transform_2(%arg0: i32) -> (i32, i32) {
    %c0_i32 = arith.constant 0 : i32
    %c0_i32_0 = arith.constant 0 : i32
    %c0_i32_1 = arith.constant 0 : i32
    return %c0_i32, %c0_i32_0 : i32, i32
  }
  func.func @transform_3(%arg0: i32) -> (i32, i32) {
    %c0_i32 = arith.constant 0 : i32
    %c0_i32_0 = arith.constant 0 : i32
    return %arg0, %c0_i32 : i32, i32
  }
  func.func @transform_4(%arg0: i32) -> (i32, i32) {
    %c0_i32 = arith.constant 0 : i32
    %c0_i32_0 = arith.constant 0 : i32
    %c0_i32_1 = arith.constant 0 : i32
    return %c0_i32, %c0_i32_0 : i32, i32
  }
  func.func @transform_5(%arg0: i32) -> (i32, i32) {
    %c0_i32 = arith.constant 0 : i32
    %c0_i32_0 = arith.constant 0 : i32
    %c0_i32_1 = arith.constant 0 : i32
    return %c0_i32, %c0_i32_0 : i32, i32
  }
  func.func @transform_6(%arg0: i32) -> (i32, i32) {
    %c0_i32 = arith.constant 0 : i32
    %c0_i32_0 = arith.constant 0 : i32
    return %arg0, %c0_i32 : i32, i32
  }
}

module attributes {stable_mosaic.version = 11 : i64} {
  func.func @_matmul_bias_kernel(%arg0: i32, %arg1: memref<16x32xbf16, #tpu.memory_space<vmem>>, %arg2: memref<32x64xbf16, #tpu.memory_space<vmem>>, %arg3: memref<1x64xf32, #tpu.memory_space<vmem>>, %arg4: memref<16x64xbf16, #tpu.memory_space<vmem>>) attributes {dimension_semantics = [#tpu.dimension_semantics<parallel>], iteration_bounds = array<i64: 1>, scalar_prefetch = 0 : i64, scratch_operands = 0 : i64, tpu.core_type = #tpu.core_type<tc>, window_params = [{transform_indices = @transform_0, window_bounds = array<i64: 16, 32>}, {pipeline_mode = #tpu.pipeline_mode<synchronous>, transform_indices = @transform_1, window_bounds = array<i64: 32, 64>}, {pipeline_mode = #tpu.pipeline_mode<synchronous>, transform_indices = @transform_2, window_bounds = array<i64: 1, 64>}, {transform_indices = @transform_3, window_bounds = array<i64: 16, 64>}]} {
    %c0 = arith.constant 0 : index
    %c0_0 = arith.constant 0 : index
    %0 = vector.load %arg1[%c0, %c0_0] : memref<16x32xbf16, #tpu.memory_space<vmem>>, vector<16x32xbf16>
    %c0_1 = arith.constant 0 : index
    %c0_2 = arith.constant 0 : index
    %1 = vector.load %arg2[%c0_1, %c0_2] : memref<32x64xbf16, #tpu.memory_space<vmem>>, vector<32x64xbf16>
    %cst = arith.constant dense<0.000000e+00> : vector<16x64xf32>
    %2 = tpu.matmul %0, %1, %cst {dimension_numbers = #tpu.dot_dimension_numbers<[1], [0], [0], [1], [0, 0, 1, 1], [], []>} : vector<16x32xbf16>, vector<32x64xbf16>, vector<16x64xf32> -> vector<16x64xf32>
    %c0_3 = arith.constant 0 : index
    %c0_4 = arith.constant 0 : index
    %3 = vector.load %arg3[%c0_3, %c0_4] : memref<1x64xf32, #tpu.memory_space<vmem>>, vector<1x64xf32>
    %4 = vector.broadcast %3 : vector<1x64xf32> to vector<16x64xf32>
    %5 = arith.addf %2, %4 : vector<16x64xf32>
    %6 = arith.mulf %5, %5 : vector<16x64xf32>
    %7 = arith.mulf %5, %6 : vector<16x64xf32>
    %cst_5 = arith.constant 4.471500e-02 : f32
    %8 = vector.broadcast %cst_5 : f32 to vector<16x64xf32>
    %9 = arith.mulf %8, %7 : vector<16x64xf32>
    %10 = arith.addf %5, %9 : vector<16x64xf32>
    %cst_6 = arith.constant 0.797884583 : f32
    %11 = vector.broadcast %cst_6 : f32 to vector<16x64xf32>
    %12 = arith.mulf %11, %10 : vector<16x64xf32>
    %13 = math.tanh %12 : vector<16x64xf32>
    %cst_7 = arith.constant 1.000000e+00 : f32
    %14 = vector.broadcast %cst_7 : f32 to vector<16x64xf32>
    %15 = arith.addf %14, %13 : vector<16x64xf32>
    %cst_8 = arith.constant 5.000000e-01 : f32
    %16 = vector.broadcast %cst_8 : f32 to vector<16x64xf32>
    %17 = arith.mulf %16, %15 : vector<16x64xf32>
    %18 = arith.mulf %5, %17 : vector<16x64xf32>
    %19 = arith.truncf %18 : vector<16x64xf32> to vector<16x64xbf16>
    %c0_9 = arith.constant 0 : index
    %c0_10 = arith.constant 0 : index
    %20 = vector.load %arg4[%c0_9, %c0_10] : memref<16x64xbf16, #tpu.memory_space<vmem>>, vector<16x64xbf16>
    tpu.vector_store %arg4[%c0_9, %c0_10], %19 {strides = array<i32>} : memref<16x64xbf16, #tpu.memory_space<vmem>>, vector<16x64xbf16>,
    return
  }
  func.func @transform_0(%arg0: i32) -> (i32, i32) {
    %c0_i32 = arith.constant 0 : i32
    %c0_i32_0 = arith.constant 0 : i32
    return %arg0, %c0_i32 : i32, i32
  }
  func.func @transform_1(%arg0: i32) -> (i32, i32) {
    %c0_i32 = arith.constant 0 : i32
    %c0_i32_0 = arith.constant 0 : i32
    %c0_i32_1 = arith.constant 0 : i32
    return %c0_i32, %c0_i32_0 : i32, i32
  }
  func.func @transform_2(%arg0: i32) -> (i32, i32) {
    %c0_i32 = arith.constant 0 : i32
    %c0_i32_0 = arith.constant 0 : i32
    %c0_i32_1 = arith.constant 0 : i32
    return %c0_i32, %c0_i32_0 : i32, i32
  }
  func.func @transform_3(%arg0: i32) -> (i32, i32) {
    %c0_i32 = arith.constant 0 : i32
    %c0_i32_0 = arith.constant 0 : i32
    return %arg0, %c0_i32 : i32, i32
  }
}

module attributes {stable_mosaic.version = 11 : i64} {
  func.func @_matmul_res_ln_kernel(%arg0: i32, %arg1: memref<16x64xbf16, #tpu.memory_space<vmem>>, %arg2: memref<64x32xbf16, #tpu.memory_space<vmem>>, %arg3: memref<1x32xf32, #tpu.memory_space<vmem>>, %arg4: memref<16x32xbf16, #tpu.memory_space<vmem>>, %arg5: memref<1x32xf32, #tpu.memory_space<vmem>>, %arg6: memref<1x32xf32, #tpu.memory_space<vmem>>, %arg7: memref<16x32xbf16, #tpu.memory_space<vmem>>) attributes {dimension_semantics = [#tpu.dimension_semantics<parallel>], iteration_bounds = array<i64: 1>, scalar_prefetch = 0 : i64, scratch_operands = 0 : i64, tpu.core_type = #tpu.core_type<tc>, window_params = [{transform_indices = @transform_0, window_bounds = array<i64: 16, 64>}, {pipeline_mode = #tpu.pipeline_mode<synchronous>, transform_indices = @transform_1, window_bounds = array<i64: 64, 32>}, {pipeline_mode = #tpu.pipeline_mode<synchronous>, transform_indices = @transform_2, window_bounds = array<i64: 1, 32>}, {transform_indices = @transform_3, window_bounds = array<i64: 16, 32>}, {pipeline_mode = #tpu.pipeline_mode<synchronous>, transform_indices = @transform_4, window_bounds = array<i64: 1, 32>}, {pipeline_mode = #tpu.pipeline_mode<synchronous>, transform_indices = @transform_5, window_bounds = array<i64: 1, 32>}, {transform_indices = @transform_6, window_bounds = array<i64: 16, 32>}]} {
    %c0 = arith.constant 0 : index
    %c0_0 = arith.constant 0 : index
    %0 = vector.load %arg1[%c0, %c0_0] : memref<16x64xbf16, #tpu.memory_space<vmem>>, vector<16x64xbf16>
    %c0_1 = arith.constant 0 : index
    %c0_2 = arith.constant 0 : index
    %1 = vector.load %arg2[%c0_1, %c0_2] : memref<64x32xbf16, #tpu.memory_space<vmem>>, vector<64x32xbf16>
    %cst = arith.constant dense<0.000000e+00> : vector<16x32xf32>
    %2 = tpu.matmul %0, %1, %cst {dimension_numbers = #tpu.dot_dimension_numbers<[1], [0], [0], [1], [0, 0, 1, 1], [], []>} : vector<16x64xbf16>, vector<64x32xbf16>, vector<16x32xf32> -> vector<16x32xf32>
    %c0_3 = arith.constant 0 : index
    %c0_4 = arith.constant 0 : index
    %3 = vector.load %arg3[%c0_3, %c0_4] : memref<1x32xf32, #tpu.memory_space<vmem>>, vector<1x32xf32>
    %4 = vector.broadcast %3 : vector<1x32xf32> to vector<16x32xf32>
    %5 = arith.addf %2, %4 : vector<16x32xf32>
    %c0_5 = arith.constant 0 : index
    %c0_6 = arith.constant 0 : index
    %6 = vector.load %arg4[%c0_5, %c0_6] : memref<16x32xbf16, #tpu.memory_space<vmem>>, vector<16x32xbf16>
    %7 = arith.extf %6 : vector<16x32xbf16> to vector<16x32xf32>
    %8 = arith.addf %5, %7 : vector<16x32xf32>
    %cst_7 = arith.constant dense<0.000000e+00> : vector<16xf32>
    %9 = vector.multi_reduction <add>, %8, %cst_7 [1] : vector<16x32xf32> to vector<16xf32>
    %10 = vector.shape_cast %9 : vector<16xf32> to vector<16x1xf32>
    %cst_8 = arith.constant 3.200000e+01 : f32
    %11 = vector.broadcast %cst_8 : f32 to vector<16x1xf32>
    %12 = arith.divf %10, %11 : vector<16x1xf32>
    %13 = vector.broadcast %12 : vector<16x1xf32> to vector<16x32xf32>
    %14 = arith.subf %8, %13 : vector<16x32xf32>
    %15 = arith.mulf %14, %14 : vector<16x32xf32>
    %cst_9 = arith.constant dense<0.000000e+00> : vector<16xf32>
    %16 = vector.multi_reduction <add>, %15, %cst_9 [1] : vector<16x32xf32> to vector<16xf32>
    %17 = vector.shape_cast %16 : vector<16xf32> to vector<16x1xf32>
    %cst_10 = arith.constant 3.200000e+01 : f32
    %18 = vector.broadcast %cst_10 : f32 to vector<16x1xf32>
    %19 = arith.divf %17, %18 : vector<16x1xf32>
    %cst_11 = arith.constant 9.99999996E-13 : f32
    %20 = vector.broadcast %cst_11 : f32 to vector<16x1xf32>
    %21 = arith.addf %19, %20 : vector<16x1xf32>
    %22 = math.rsqrt %21 : vector<16x1xf32>
    %23 = vector.broadcast %12 : vector<16x1xf32> to vector<16x32xf32>
    %24 = arith.subf %8, %23 : vector<16x32xf32>
    %25 = vector.broadcast %22 : vector<16x1xf32> to vector<16x32xf32>
    %26 = arith.mulf %24, %25 : vector<16x32xf32>
    %c0_12 = arith.constant 0 : index
    %c0_13 = arith.constant 0 : index
    %27 = vector.load %arg5[%c0_12, %c0_13] : memref<1x32xf32, #tpu.memory_space<vmem>>, vector<1x32xf32>
    %28 = vector.broadcast %27 : vector<1x32xf32> to vector<16x32xf32>
    %29 = arith.mulf %26, %28 : vector<16x32xf32>
    %c0_14 = arith.constant 0 : index
    %c0_15 = arith.constant 0 : index
    %30 = vector.load %arg6[%c0_14, %c0_15] : memref<1x32xf32, #tpu.memory_space<vmem>>, vector<1x32xf32>
    %31 = vector.broadcast %30 : vector<1x32xf32> to vector<16x32xf32>
    %32 = arith.addf %29, %31 : vector<16x32xf32>
    %33 = arith.truncf %32 : vector<16x32xf32> to vector<16x32xbf16>
    %c0_16 = arith.constant 0 : index
    %c0_17 = arith.constant 0 : index
    %34 = vector.load %arg7[%c0_16, %c0_17] : memref<16x32xbf16, #tpu.memory_space<vmem>>, vector<16x32xbf16>
    tpu.vector_store %arg7[%c0_16, %c0_17], %33 {strides = array<i32>} : memref<16x32xbf16, #tpu.memory_space<vmem>>, vector<16x32xbf16>,
    return
  }
  func.func @transform_0(%arg0: i32) -> (i32, i32) {
    %c0_i32 = arith.constant 0 : i32
    %c0_i32_0 = arith.constant 0 : i32
    return %arg0, %c0_i32 : i32, i32
  }
  func.func @transform_1(%arg0: i32) -> (i32, i32) {
    %c0_i32 = arith.constant 0 : i32
    %c0_i32_0 = arith.constant 0 : i32
    %c0_i32_1 = arith.constant 0 : i32
    return %c0_i32, %c0_i32_0 : i32, i32
  }
  func.func @transform_2(%arg0: i32) -> (i32, i32) {
    %c0_i32 = arith.constant 0 : i32
    %c0_i32_0 = arith.constant 0 : i32
    %c0_i32_1 = arith.constant 0 : i32
    return %c0_i32, %c0_i32_0 : i32, i32
  }
  func.func @transform_3(%arg0: i32) -> (i32, i32) {
    %c0_i32 = arith.constant 0 : i32
    %c0_i32_0 = arith.constant 0 : i32
    return %arg0, %c0_i32 : i32, i32
  }
  func.func @transform_4(%arg0: i32) -> (i32, i32) {
    %c0_i32 = arith.constant 0 : i32
    %c0_i32_0 = arith.constant 0 : i32
    %c0_i32_1 = arith.constant 0 : i32
    return %c0_i32, %c0_i32_0 : i32, i32
  }
  func.func @transform_5(%arg0: i32) -> (i32, i32) {
    %c0_i32 = arith.constant 0 : i32
    %c0_i32_0 = arith.constant 0 : i32
    %c0_i32_1 = arith.constant 0 : i32
    return %c0_i32, %c0_i32_0 : i32, i32
  }
  func.func @transform_6(%arg0: i32) -> (i32, i32) {
    %c0_i32 = arith.constant 0 : i32
    %c0_i32_0 = arith.constant 0 : i32
    return %arg0, %c0_i32 : i32, i32
  }
}

module attributes {stable_mosaic.version = 11 : i64} {
  func.func @_matmul_bias_kernel(%arg0: i32, %arg1: memref<2x32xbf16, #tpu.memory_space<vmem>>, %arg2: memref<32x128xbf16, #tpu.memory_space<vmem>>, %arg3: memref<1x128xf32, #tpu.memory_space<vmem>>, %arg4: memref<2x128xf32, #tpu.memory_space<vmem>>) attributes {dimension_semantics = [#tpu.dimension_semantics<parallel>], iteration_bounds = array<i64: 1>, scalar_prefetch = 0 : i64, scratch_operands = 0 : i64, tpu.core_type = #tpu.core_type<tc>, window_params = [{transform_indices = @transform_0, window_bounds = array<i64: 2, 32>}, {pipeline_mode = #tpu.pipeline_mode<synchronous>, transform_indices = @transform_1, window_bounds = array<i64: 32, 128>}, {pipeline_mode = #tpu.pipeline_mode<synchronous>, transform_indices = @transform_2, window_bounds = array<i64: 1, 128>}, {transform_indices = @transform_3, window_bounds = array<i64: 2, 128>}]} {
    %c0 = arith.constant 0 : index
    %c0_0 = arith.constant 0 : index
    %0 = vector.load %arg1[%c0, %c0_0] : memref<2x32xbf16, #tpu.memory_space<vmem>>, vector<2x32xbf16>
    %c0_1 = arith.constant 0 : index
    %c0_2 = arith.constant 0 : index
    %1 = vector.load %arg2[%c0_1, %c0_2] : memref<32x128xbf16, #tpu.memory_space<vmem>>, vector<32x128xbf16>
    %cst = arith.constant dense<0.000000e+00> : vector<2x128xf32>
    %2 = tpu.matmul %0, %1, %cst {dimension_numbers = #tpu.dot_dimension_numbers<[1], [0], [0], [1], [0, 0, 1, 1], [], []>} : vector<2x32xbf16>, vector<32x128xbf16>, vector<2x128xf32> -> vector<2x128xf32>
    %c0_3 = arith.constant 0 : index
    %c0_4 = arith.constant 0 : index
    %3 = vector.load %arg3[%c0_3, %c0_4] : memref<1x128xf32, #tpu.memory_space<vmem>>, vector<1x128xf32>
    %4 = vector.broadcast %3 : vector<1x128xf32> to vector<2x128xf32>
    %5 = arith.addf %2, %4 : vector<2x128xf32>
    %c0_5 = arith.constant 0 : index
    %c0_6 = arith.constant 0 : index
    %6 = vector.load %arg4[%c0_5, %c0_6] : memref<2x128xf32, #tpu.memory_space<vmem>>, vector<2x128xf32>
    tpu.vector_store %arg4[%c0_5, %c0_6], %5 {strides = array<i32>} : memref<2x128xf32, #tpu.memory_space<vmem>>, vector<2x128xf32>,
    return
  }
  func.func @transform_0(%arg0: i32) -> (i32, i32) {
    %c0_i32 = arith.constant 0 : i32
    %c0_i32_0 = arith.constant 0 : i32
    return %arg0, %c0_i32 : i32, i32
  }
  func.func @transform_1(%arg0: i32) -> (i32, i32) {
    %c0_i32 = arith.constant 0 : i32
    %c0_i32_0 = arith.constant 0 : i32
    %c0_i32_1 = arith.constant 0 : i32
    return %c0_i32, %c0_i32_0 : i32, i32
  }
  func.func @transform_2(%arg0: i32) -> (i32, i32) {
    %c0_i32 = arith.constant 0 : i32
    %c0_i32_0 = arith.constant 0 : i32
    %c0_i32_1 = arith.constant 0 : i32
    return %c0_i32, %c0_i32_0 : i32, i32
  }
  func.func @transform_3(%arg0: i32) -> (i32, i32) {
    %c0_i32 = arith.constant 0 : i32
    %c0_i32_0 = arith.constant 0 : i32
    return %arg0, %c0_i32 : i32, i32
  }
}

module attributes {stable_mosaic.version = 11 : i64} {
  func.func @_matmul_bias_kernel(%arg0: i32, %arg1: memref<2x32xbf16, #tpu.memory_space<vmem>>, %arg2: memref<32x32xbf16, #tpu.memory_space<vmem>>, %arg3: memref<1x32xf32, #tpu.memory_space<vmem>>, %arg4: memref<2x32xbf16, #tpu.memory_space<vmem>>) attributes {dimension_semantics = [#tpu.dimension_semantics<parallel>], iteration_bounds = array<i64: 1>, scalar_prefetch = 0 : i64, scratch_operands = 0 : i64, tpu.core_type = #tpu.core_type<tc>, window_params = [{transform_indices = @transform_0, window_bounds = array<i64: 2, 32>}, {pipeline_mode = #tpu.pipeline_mode<synchronous>, transform_indices = @transform_1, window_bounds = array<i64: 32, 32>}, {pipeline_mode = #tpu.pipeline_mode<synchronous>, transform_indices = @transform_2, window_bounds = array<i64: 1, 32>}, {transform_indices = @transform_3, window_bounds = array<i64: 2, 32>}]} {
    %c0 = arith.constant 0 : index
    %c0_0 = arith.constant 0 : index
    %0 = vector.load %arg1[%c0, %c0_0] : memref<2x32xbf16, #tpu.memory_space<vmem>>, vector<2x32xbf16>
    %c0_1 = arith.constant 0 : index
    %c0_2 = arith.constant 0 : index
    %1 = vector.load %arg2[%c0_1, %c0_2] : memref<32x32xbf16, #tpu.memory_space<vmem>>, vector<32x32xbf16>
    %cst = arith.constant dense<0.000000e+00> : vector<2x32xf32>
    %2 = tpu.matmul %0, %1, %cst {dimension_numbers = #tpu.dot_dimension_numbers<[1], [0], [0], [1], [0, 0, 1, 1], [], []>} : vector<2x32xbf16>, vector<32x32xbf16>, vector<2x32xf32> -> vector<2x32xf32>
    %c0_3 = arith.constant 0 : index
    %c0_4 = arith.constant 0 : index
    %3 = vector.load %arg3[%c0_3, %c0_4] : memref<1x32xf32, #tpu.memory_space<vmem>>, vector<1x32xf32>
    %4 = vector.broadcast %3 : vector<1x32xf32> to vector<2x32xf32>
    %5 = arith.addf %2, %4 : vector<2x32xf32>
    %6 = math.tanh %5 : vector<2x32xf32>
    %7 = arith.truncf %6 : vector<2x32xf32> to vector<2x32xbf16>
    %c0_5 = arith.constant 0 : index
    %c0_6 = arith.constant 0 : index
    %8 = vector.load %arg4[%c0_5, %c0_6] : memref<2x32xbf16, #tpu.memory_space<vmem>>, vector<2x32xbf16>
    tpu.vector_store %arg4[%c0_5, %c0_6], %7 {strides = array<i32>} : memref<2x32xbf16, #tpu.memory_space<vmem>>, vector<2x32xbf16>,
    return
  }
  func.func @transform_0(%arg0: i32) -> (i32, i32) {
    %c0_i32 = arith.constant 0 : i32
    %c0_i32_0 = arith.constant 0 : i32
    return %arg0, %c0_i32 : i32, i32
  }
  func.func @transform_1(%arg0: i32) -> (i32, i32) {
    %c0_i32 = arith.constant 0 : i32
    %c0_i32_0 = arith.constant 0 : i32
    %c0_i32_1 = arith.constant 0 : i32
    return %c0_i32, %c0_i32_0 : i32, i32
  }
  func.func @transform_2(%arg0: i32) -> (i32, i32) {
    %c0_i32 = arith.constant 0 : i32
    %c0_i32_0 = arith.constant 0 : i32
    %c0_i32_1 = arith.constant 0 : i32
    return %c0_i32, %c0_i32_0 : i32, i32
  }
  func.func @transform_3(%arg0: i32) -> (i32, i32) {
    %c0_i32 = arith.constant 0 : i32
    %c0_i32_0 = arith.constant 0 : i32
    return %arg0, %c0_i32 : i32, i32
  }
}

module attributes {stable_mosaic.version = 11 : i64} {
  func.func @_dual_xent_kernel(%arg0: memref<2x128xf32, #tpu.memory_space<vmem>>, %arg1: memref<2x1xi32, #tpu.memory_space<vmem>>, %arg2: memref<2x1xi32, #tpu.memory_space<vmem>>, %arg3: memref<1x1xf32, #tpu.memory_space<vmem>>) attributes {dimension_semantics = [], scalar_prefetch = 0 : i64, scratch_operands = 0 : i64, tpu.core_type = #tpu.core_type<tc>} {
    %c0 = arith.constant 0 : index
    %c0_0 = arith.constant 0 : index
    %0 = vector.load %arg0[%c0, %c0_0] : memref<2x128xf32, #tpu.memory_space<vmem>>, vector<2x128xf32>
    %1 = tpu.iota {dimensions = array<i32: 1>} : vector<2x128xi32>
    %c3_i32 = arith.constant 3 : i32
    %2 = vector.broadcast %c3_i32 : i32 to vector<2x128xi32>
    %3 = arith.cmpi slt, %1, %2 : vector<2x128xi32>
    %c0_1 = arith.constant 0 : index
    %c0_2 = arith.constant 0 : index
    %4 = vector.load %arg1[%c0_1, %c0_2] : memref<2x1xi32, #tpu.memory_space<vmem>>, vector<2x1xi32>
    %cst = arith.constant -1.000000e+30 : f32
    %5 = vector.broadcast %cst : f32 to vector<2x128xf32>
    %6 = arith.select %3, %0, %5 : vector<2x128xi1>, vector<2x128xf32>
    %cst_3 = arith.constant dense<0xFF800000> : vector<2xf32>
    %7 = vector.multi_reduction <maximumf>, %6, %cst_3 [1] : vector<2x128xf32> to vector<2xf32>
    %8 = vector.shape_cast %7 : vector<2xf32> to vector<2x1xf32>
    %9 = vector.broadcast %8 : vector<2x1xf32> to vector<2x128xf32>
    %10 = arith.subf %6, %9 : vector<2x128xf32>
    %11 = math.exp %10 : vector<2x128xf32>
    %cst_4 = arith.constant 0.000000e+00 : f32
    %12 = vector.broadcast %cst_4 : f32 to vector<2x128xf32>
    %13 = arith.select %3, %11, %12 : vector<2x128xi1>, vector<2x128xf32>
    %cst_5 = arith.constant dense<0.000000e+00> : vector<2xf32>
    %14 = vector.multi_reduction <add>, %13, %cst_5 [1] : vector<2x128xf32> to vector<2xf32>
    %15 = vector.shape_cast %14 : vector<2xf32> to vector<2x1xf32>
    %16 = math.log %15 : vector<2x1xf32>
    %17 = arith.addf %16, %8 : vector<2x1xf32>
    %18 = vector.broadcast %4 : vector<2x1xi32> to vector<2x128xi32>
    %19 = arith.cmpi eq, %18, %1 : vector<2x128xi32>
    %20 = arith.extui %19 : vector<2x128xi1> to vector<2x128xi32>
    %21 = arith.sitofp %20 : vector<2x128xi32> to vector<2x128xf32>
    %22 = arith.mulf %21, %0 : vector<2x128xf32>
    %cst_6 = arith.constant dense<0.000000e+00> : vector<2xf32>
    %23 = vector.multi_reduction <add>, %22, %cst_6 [1] : vector<2x128xf32> to vector<2xf32>
    %24 = vector.shape_cast %23 : vector<2xf32> to vector<2x1xf32>
    %25 = arith.subf %17, %24 : vector<2x1xf32>
    %cst_7 = arith.constant dense<0.000000e+00> : vector<1xf32>
    %26 = vector.multi_reduction <add>, %25, %cst_7 [0] : vector<2x1xf32> to vector<1xf32>
    %27 = vector.shape_cast %26 : vector<1xf32> to vector<1x1xf32>
    %cst_8 = arith.constant 2.000000e+00 : f32
    %28 = vector.broadcast %cst_8 : f32 to vector<1x1xf32>
    %29 = arith.divf %27, %28 : vector<1x1xf32>
    %c3_i32_9 = arith.constant 3 : i32
    %30 = vector.broadcast %c3_i32_9 : i32 to vector<2x128xi32>
    %31 = arith.cmpi sge, %1, %30 : vector<2x128xi32>
    %c8_i32 = arith.constant 8 : i32
    %32 = vector.broadcast %c8_i32 : i32 to vector<2x128xi32>
    %33 = arith.cmpi slt, %1, %32 : vector<2x128xi32>
    %34 = arith.andi %31, %33 : vector<2x128xi1>
    %c0_10 = arith.constant 0 : index
    %c0_11 = arith.constant 0 : index
    %35 = vector.load %arg2[%c0_10, %c0_11] : memref<2x1xi32, #tpu.memory_space<vmem>>, vector<2x1xi32>
    %c3_i32_12 = arith.constant 3 : i32
    %36 = vector.broadcast %c3_i32_12 : i32 to vector<2x1xi32>
    %37 = arith.addi %35, %36 : vector<2x1xi32>
    %cst_13 = arith.constant -1.000000e+30 : f32
    %38 = vector.broadcast %cst_13 : f32 to vector<2x128xf32>
    %39 = arith.select %34, %0, %38 : vector<2x128xi1>, vector<2x128xf32>
    %cst_14 = arith.constant dense<0xFF800000> : vector<2xf32>
    %40 = vector.multi_reduction <maximumf>, %39, %cst_14 [1] : vector<2x128xf32> to vector<2xf32>
    %41 = vector.shape_cast %40 : vector<2xf32> to vector<2x1xf32>
    %42 = vector.broadcast %41 : vector<2x1xf32> to vector<2x128xf32>
    %43 = arith.subf %39, %42 : vector<2x128xf32>
    %44 = math.exp %43 : vector<2x128xf32>
    %cst_15 = arith.constant 0.000000e+00 : f32
    %45 = vector.broadcast %cst_15 : f32 to vector<2x128xf32>
    %46 = arith.select %34, %44, %45 : vector<2x128xi1>, vector<2x128xf32>
    %cst_16 = arith.constant dense<0.000000e+00> : vector<2xf32>
    %47 = vector.multi_reduction <add>, %46, %cst_16 [1] : vector<2x128xf32> to vector<2xf32>
    %48 = vector.shape_cast %47 : vector<2xf32> to vector<2x1xf32>
    %49 = math.log %48 : vector<2x1xf32>
    %50 = arith.addf %49, %41 : vector<2x1xf32>
    %51 = vector.broadcast %37 : vector<2x1xi32> to vector<2x128xi32>
    %52 = arith.cmpi eq, %51, %1 : vector<2x128xi32>
    %53 = arith.extui %52 : vector<2x128xi1> to vector<2x128xi32>
    %54 = arith.sitofp %53 : vector<2x128xi32> to vector<2x128xf32>
    %55 = arith.mulf %54, %0 : vector<2x128xf32>
    %cst_17 = arith.constant dense<0.000000e+00> : vector<2xf32>
    %56 = vector.multi_reduction <add>, %55, %cst_17 [1] : vector<2x128xf32> to vector<2xf32>
    %57 = vector.shape_cast %56 : vector<2xf32> to vector<2x1xf32>
    %58 = arith.subf %50, %57 : vector<2x1xf32>
    %cst_18 = arith.constant dense<0.000000e+00> : vector<1xf32>
    %59 = vector.multi_reduction <add>, %58, %cst_18 [0] : vector<2x1xf32> to vector<1xf32>
    %60 = vector.shape_cast %59 : vector<1xf32> to vector<1x1xf32>
    %cst_19 = arith.constant 2.000000e+00 : f32
    %61 = vector.broadcast %cst_19 : f32 to vector<1x1xf32>
    %62 = arith.divf %60, %61 : vector<1x1xf32>
    %63 = arith.addf %29, %62 : vector<1x1xf32>
    %c0_20 = arith.constant 0 : index
    %c0_21 = arith.constant 0 : index
    %64 = vector.load %arg3[%c0_20, %c0_21] : memref<1x1xf32, #tpu.memory_space<vmem>>, vector<1x1xf32>
    tpu.vector_store %arg3[%c0_20, %c0_21], %63 {strides = array<i32>} : memref<1x1xf32, #tpu.memory_space<vmem>>, vector<1x1xf32>,
    return
  }
}

</mosaic_0001>

<bundles_post_ra>
// kernel: _lambda_.14
= control target key start
LH: loop header
LB: loop body
LE: loop exit
PB: predicated region body
PF: predicated region fallthrough
CT: control target
= control target key end

     0   :  { %8 = vsyncpa [#allocation3], 0  ;;  %s328_s0 = inlined_call_operand.hbm [shape: f32[16,32], index: 0, kind: input, shape index: {}]   ;;  %s329_s1 = inlined_call_operand.hbm [shape: f32[1,32], index: 1, kind: input, shape index: {}]   ;;  %s330_s2 = inlined_call_operand.hbm [shape: f32[1,32], index: 2, kind: input, shape index: {}]   ;;  %s331_s3 = inlined_call_operand.hbm [shape: bf16[16,32], index: 3, kind: output, shape index: {}]  }
   0x1   :  { %9 = vsyncpa [#allocation6], 0 }
   0x2   :  { %10 = vsyncpa [#allocation4], 0  ;;  %s241_s12 = smov [#allocation5]   ;;  %s242_s14 = smov [#allocation2]  }
   0x3   :  { %s29_s13 = sshll.u32 %s241_s12, 4  ;;  %s16_s15 = sshll.u32 %s242_s14, 4  ;;  %s30_s13 = int_to_ptr.vmem [resolvable:$true] %s29_s13  ;;  %s269_s15 = int_to_ptr.vmem [resolvable:$true] %s16_s15 }
   0x4   :  { %s147_s18 = scalar_lea.hbm %s329_s1, 16 }
   0x5   :  { %p148_p0 = scmp.ne.s32.totalorder %s329_s1, %s147_s18  ;;  %p151_p1 = scmp.lt.u32.totalorder %s147_s18, %s329_s1 }
   0x7   :  { %p153_p2 = pnand %p151_p1, %p148_p0 }
   0x9   :  { %156 = shalt.err (!%p153_p2)
}
   0xa   :  { %s157_s23 = scalar_lea.vmem %s30_s13, 16  ;;  %s161_s24 = scalar_lea.vmem %s30_s13, 32 }
   0xb   :  { %p158_p3 = scmp.ne.s32.totalorder %s30_s13, %s157_s23  ;;  %p162_p4 = scmp.lt.s32.totalorder %s30_s13, %s30_s13 }
   0xc   :  { %p163_p5 = scmp.lt.s32.totalorder %s161_s24, %s157_s23 }
   0xe   :  { %p164_p6 = por %p163_p5, %p162_p4 }
  0x10   :  { %p165_p7 = pnand %p164_p6, %p158_p3 }
  0x12   :  { %168 = shalt.err (!%p165_p7)
}
  0x13   :  { %32 = dma.hbm_to_vmem [thread:$0]  %s329_s1, 16, %s30_s13, [#allocation6]  }
  0x14   :  { %s169_s29 = scalar_lea.hbm %s328_s0, 256 }
  0x15   :  { %p170_p8 = scmp.ne.s32.totalorder %s328_s0, %s169_s29  ;;  %p173_p9 = scmp.lt.u32.totalorder %s169_s29, %s328_s0 }
  0x17   :  { %p175_p10 = pnand %p173_p9, %p170_p8 }
  0x19   :  { %178 = shalt.err (!%p175_p10)
}
  0x1a   :  { %s179_s7 = scalar_lea.vmem %s269_s15, 256  ;;  %p184_p12 = scmp.lt.s32.totalorder %s269_s15, %s269_s15 }
  0x1b   :  { %p180_p11 = scmp.ne.s32.totalorder %s269_s15, %s179_s7  ;;  %p185_p13 = scmp.lt.s32.totalorder %s179_s7, %s179_s7 }
  0x1d   :  { %p186_p0 = por %p185_p13, %p184_p12 }
  0x1f   :  { %p187_p1 = pnand %p186_p0, %p180_p11 }
  0x21   :  { %190 = shalt.err (!%p187_p1)
}
  0x22   :  { %s243_s1 = smov 128   ;;  %s244_s8 = smov 8  }
  0x23   :  { %22 = dma.hbm_to_vmem [thread:$0]  %s328_s0, 256, %s269_s15, [#allocation3], %s243_s1, %s243_s1, %s244_s8  }
  0x24   :  { %s245_s11 = smov [#allocation7]   ;;  %s191_s16 = scalar_lea.hbm %s330_s2, 16 }
  0x25   :  { %s39_s12 = sshll.u32 %s245_s11, 4  ;;  %p192_p2 = scmp.ne.s32.totalorder %s330_s2, %s191_s16  ;;  %s40_s12 = int_to_ptr.vmem [resolvable:$true] %s39_s12 }
  0x26   :  { %p195_p3 = scmp.lt.u32.totalorder %s191_s16, %s330_s2 }
  0x28   :  { %p197_p4 = pnand %p195_p3, %p192_p2 }
  0x2a   :  { %200 = shalt.err (!%p197_p4)
}
  0x2b   :  { %s201_s21 = scalar_lea.vmem %s40_s12, 16  ;;  %s205_s0 = scalar_lea.vmem %s40_s12, 32 }
  0x2c   :  { %p202_p5 = scmp.ne.s32.totalorder %s40_s12, %s201_s21  ;;  %p206_p6 = scmp.lt.s32.totalorder %s40_s12, %s40_s12 }
  0x2d   :  { %p207_p7 = scmp.lt.s32.totalorder %s205_s0, %s201_s21 }
  0x2f   :  { %p208_p8 = por %p207_p7, %p206_p6 }
  0x31   :  { %p209_p9 = pnand %p208_p8, %p202_p5 }
  0x33   :  { %212 = shalt.err (!%p209_p9)
}
  0x34   :  { %42 = dma.hbm_to_vmem [thread:$0]  %s330_s2, 16, %s40_s12, [#allocation6]  }
  0x35   :  { %235 = dma.done.wait [#allocation3], 256  }
  0x36   :  { %236 = vsyncadd [#allocation3], 4294967040 }
  0x37   :  { %237 = dma.done.wait [#allocation6], 32  }
  0x38   :  { %238 = vsyncadd [#allocation6], 4294967264  ;;  %vm54_vm0 = vcmask 261120   ;;  %v52_v0 = vld [vmem:[#allocation2] sm:$0xff]  ;;  %v53_v1 = vld [vmem:[#allocation2 + $0x8] sm:$0xff]  ;;  %vm108_vm1 = vcmask 257024  }
  0x39   :  { %v55_v2 = vsel %vm54_vm0, %v52_v0, 0.0  ;;  %v58_v3 = vsel %vm54_vm0, %v53_v1, 0.0  ;;  %v129_v21 = vld [vmem:[#allocation5] ss:$0 sm:$0xff]  ;;  %v130_v23 = vld [vmem:[#allocation7] ss:$0 sm:$0xff] }
  0x3a   :  { %56 = vadd.xlane.f32.xlu0 %v55_v2  ;;  %s246_s2 = smov [#allocation8]  }
  0x3b   :  { %s116_s23 = sshll.u32 %s246_s2, 4  ;;  %s117_s23 = int_to_ptr.vmem [resolvable:$true] %s116_s23 }
  0x3c   :  { %s213_s24 = scalar_lea.vmem %s117_s23, 128  ;;  %p218_p11 = scmp.lt.s32.totalorder %s117_s23, %s117_s23 }
  0x3d   :  { %p214_p10 = scmp.ne.s32.totalorder %s117_s23, %s213_s24  ;;  %p219_p12 = scmp.lt.s32.totalorder %s213_s24, %s213_s24 }
  0x3e   :  { %59 = vadd.xlane.f32.xlu0 %v58_v3 }
  0x3f   :  { %p220_p13 = por %p219_p12, %p218_p11 }
  0x41   :  { %p221_p0 = pnand %p220_p13, %p214_p10 }
  0xc7   :  { %v57_v4 = vpop.xlane.xlu0 %56 }
  0xc8   :  { %v62_v5 = vmul.f32 0.03125, %v57_v4 }
  0xca   :  { %v64_v6 = vsub.f32 %v52_v0, %v62_v5 }
  0xcb   :  { %v60_v7 = vpop.xlane.xlu0 %59 }
  0xcc   :  { %v63_v8 = vmul.f32 0.03125, %v60_v7  ;;  %v66_v9 = vmul.f32 %v64_v6, %v64_v6 }
  0xce   :  { %v65_v10 = vsub.f32 %v53_v1, %v63_v8  ;;  %v68_v11 = vsel %vm54_vm0, %v66_v9, 0.0 }
  0xcf   :  { %69 = vadd.xlane.f32.xlu1 %v68_v11 }
  0xd0   :  { %v67_v12 = vmul.f32 %v65_v10, %v65_v10 }
  0xd2   :  { %v71_v13 = vsel %vm54_vm0, %v67_v12, 0.0 }
  0xd3   :  { %72 = vadd.xlane.f32.xlu1 %v71_v13 }
 0x15c   :  { %v70_v14 = vpop.xlane.xlu1 %69 }
 0x15d   :  { %v74_v15 = vmul.f32 0.03125, %v70_v14 }
 0x15f   :  { %v76_v16 = vadd.f32 1e-12, %v74_v15 }
 0x160   :  { %v73_v17 = vpop.xlane.xlu1 %72 }
 0x161   :  { %143 = vrsqrt.f32 %v76_v16  ;;  %v75_v18 = vmul.f32 0.03125, %v73_v17 }
 0x163   :  { %v77_v19 = vadd.f32 1e-12, %v75_v18 }
 0x165   :  { %145 = vrsqrt.f32 %v77_v19 }
 0x16b   :  { %v144_v20 = vpop.eup %143 }
 0x16c   :  { %v80_v22 = vmul.f32 %v144_v20, %v64_v6 }
 0x16e   :  { %v89_v24 = vmul.f32 %v129_v21, %v80_v22 }
 0x16f   :  { %v146_v25 = vpop.eup %145 }
 0x170   :  { %v81_v26 = vmul.f32 %v146_v25, %v65_v10  ;;  %v98_v27 = vadd.f32 %v130_v23, %v89_v24 }
 0x172   :  { %v90_v28 = vmul.f32 %v129_v21, %v81_v26  ;;  %v133_v29 = vpack.c.bf16 %v98_v27, %v98_v27 }
 0x174   :  { %v99_v30 = vadd.f32 %v130_v23, %v90_v28  ;;  %109 = vst.msk [vmem:[#allocation8] sm:$0xf] %vm108_vm1, %v133_v29 }
 0x176   :  { %v134_v31 = vpack.c.bf16 %v99_v30, %v99_v30 }
 0x178   :  { %110 = vst.msk [vmem:[#allocation8 + $0x4] sm:$0xf] %vm108_vm1, %v134_v31 }
 0x179   :  { %224 = shalt.err (!%p221_p0)
}
 0x17a   :  { %s225_s27 = scalar_lea.hbm %s331_s3, 128 }
 0x17b   :  { %p226_p1 = scmp.ne.s32.totalorder %s331_s3, %s225_s27  ;;  %p229_p2 = scmp.lt.u32.totalorder %s225_s27, %s331_s3 }
 0x17d   :  { %p231_p3 = pnand %p229_p2, %p226_p1 }
 0x17f   :  { %234 = shalt.err (!%p231_p3)
}
 0x180   :  { %s247_s5 = smov 64   ;;  %s248_s6 = smov 4  }
 0x181   :  { %122 = dma.vmem_to_hbm [thread:$0]  %s117_s23, 128, %s331_s3, [#allocation4], %s247_s5, %s247_s5, %s248_s6  }
 0x182   :  { %239 = dma.done.wait [#allocation4], 128  }
 0x183   :  { %240 = vsyncadd [#allocation4], 4294967168 }
 0x184   :  { %126 = vsyncpa [#allocation3], 1 }
 0x185   :  { %127 = vsyncpa [#allocation6], 1 }
 0x186   :  { %128 = vsyncpa [#allocation4], 1 }

// kernel: _lambda_.15
= control target key start
LH: loop header
LB: loop body
LE: loop exit
PB: predicated region body
PF: predicated region fallthrough
CT: control target
= control target key end

     0   :  { %8 = vsyncpa [#allocation3], 0  ;;  %s376_s0 = inlined_call_operand.hbm [shape: bf16[16,32], index: 0, kind: input, shape index: {}]   ;;  %s377_s1 = inlined_call_operand.hbm [shape: bf16[32,96], index: 1, kind: input, shape index: {}]   ;;  %s378_s2 = inlined_call_operand.hbm [shape: f32[1,96], index: 2, kind: input, shape index: {}]   ;;  %s379_s3 = inlined_call_operand.hbm [shape: bf16[16,96], index: 3, kind: output, shape index: {}]  }
   0x1   :  { %9 = vsyncpa [#allocation6], 0 }
   0x2   :  { %10 = vsyncpa [#allocation4], 0  ;;  %s284_s12 = smov [#allocation5]   ;;  %s285_s14 = smov [#allocation2]  }
   0x3   :  { %s28_s13 = sshll.u32 %s284_s12, 4  ;;  %s16_s15 = sshll.u32 %s285_s14, 4  ;;  %s29_s13 = int_to_ptr.vmem [resolvable:$true] %s28_s13  ;;  %s312_s15 = int_to_ptr.vmem [resolvable:$true] %s16_s15 }
   0x4   :  { %s190_s18 = scalar_lea.hbm %s377_s1, 256 }
   0x5   :  { %p191_p0 = scmp.ne.s32.totalorder %s377_s1, %s190_s18  ;;  %p194_p1 = scmp.lt.u32.totalorder %s190_s18, %s377_s1 }
   0x7   :  { %p196_p2 = pnand %p194_p1, %p191_p0 }
   0x9   :  { %199 = shalt.err (!%p196_p2)
}
   0xa   :  { %s200_s23 = scalar_lea.vmem %s29_s13, 256  ;;  %p205_p4 = scmp.lt.s32.totalorder %s29_s13, %s29_s13 }
   0xb   :  { %p201_p3 = scmp.ne.s32.totalorder %s29_s13, %s200_s23  ;;  %p206_p5 = scmp.lt.s32.totalorder %s200_s23, %s200_s23 }
   0xd   :  { %p207_p6 = por %p206_p5, %p205_p4 }
   0xf   :  { %p208_p7 = pnand %p207_p6, %p201_p3 }
  0x11   :  { %211 = shalt.err (!%p208_p7)
}
  0x12   :  { %s286_s24 = smov 64   ;;  %s287_s25 = smov 4  }
  0x13   :  { %34 = dma.hbm_to_vmem [thread:$0]  %s377_s1, 256, %s29_s13, [#allocation6], %s286_s24, %s286_s24, %s287_s25  }
  0x14   :  { %s212_s30 = scalar_lea.hbm %s376_s0, 128 }
  0x15   :  { %p213_p8 = scmp.ne.s32.totalorder %s376_s0, %s212_s30  ;;  %p216_p9 = scmp.lt.u32.totalorder %s212_s30, %s376_s0 }
  0x17   :  { %p218_p10 = pnand %p216_p9, %p213_p8 }
  0x19   :  { %221 = shalt.err (!%p218_p10)
}
  0x1a   :  { %s222_s8 = scalar_lea.vmem %s312_s15, 128  ;;  %p227_p12 = scmp.lt.s32.totalorder %s312_s15, %s312_s15 }
  0x1b   :  { %p223_p11 = scmp.ne.s32.totalorder %s312_s15, %s222_s8  ;;  %p228_p13 = scmp.lt.s32.totalorder %s222_s8, %s222_s8 }
  0x1d   :  { %p229_p0 = por %p228_p13, %p227_p12 }
  0x1f   :  { %p230_p1 = pnand %p229_p0, %p223_p11 }
  0x21   :  { %233 = shalt.err (!%p230_p1)
}
  0x22   :  { %22 = dma.hbm_to_vmem [thread:$0]  %s376_s0, 128, %s312_s15, [#allocation3], %s286_s24, %s286_s24, %s287_s25  }
  0x23   :  { %s288_s10 = smov [#allocation7]   ;;  %s234_s14 = scalar_lea.hbm %s378_s2, 16 }
  0x24   :  { %s41_s11 = sshll.u32 %s288_s10, 4  ;;  %p235_p2 = scmp.ne.s32.totalorder %s378_s2, %s234_s14  ;;  %s42_s11 = int_to_ptr.vmem [resolvable:$true] %s41_s11 }
  0x25   :  { %p238_p3 = scmp.lt.u32.totalorder %s234_s14, %s378_s2 }
  0x27   :  { %p240_p4 = pnand %p238_p3, %p235_p2 }
  0x29   :  { %243 = shalt.err (!%p240_p4)
}
  0x2a   :  { %s244_s20 = scalar_lea.vmem %s42_s11, 16  ;;  %s248_s0 = scalar_lea.vmem %s42_s11, 32 }
  0x2b   :  { %p245_p5 = scmp.ne.s32.totalorder %s42_s11, %s244_s20  ;;  %p249_p6 = scmp.lt.s32.totalorder %s42_s11, %s42_s11 }
  0x2c   :  { %p250_p7 = scmp.lt.s32.totalorder %s248_s0, %s244_s20 }
  0x2e   :  { %p251_p8 = por %p250_p7, %p249_p6 }
  0x30   :  { %p252_p9 = pnand %p251_p8, %p245_p5 }
  0x32   :  { %255 = shalt.err (!%p252_p9)
}
  0x33   :  { %44 = dma.hbm_to_vmem [thread:$0]  %s378_s2, 16, %s42_s11, [#allocation6]  }
  0x34   :  { %278 = dma.done.wait [#allocation3], 128  }
  0x35   :  { %279 = vsyncadd [#allocation3], 4294967168 }
  0x36   :  { %280 = dma.done.wait [#allocation6], 272  }
  0x37   :  { %281 = vsyncadd [#allocation6], 4294967024  ;;  %v289_v0 = vmov 0.0   ;;  %vm290_vm0 = vmmov 0   ;;  %v187_v1 = vld [vmem:[#allocation5] sm:$0xff]   ;;  %v188_v2 = vld [vmem:[#allocation5 + $0x8] sm:$0xff]  }
  0x38   :  { %171 = vmatprep.subr.bf16.mxu0 %v289_v0  ;;  %175 = vmatprep.mubr.msk.bf16.mxu0 %vm290_vm0, %v289_v0  ;;  %v189_v3 = vld [vmem:[#allocation2] sm:$0xff]   ;;  %vm85_vm1 = vcmask 261120   ;;  %v159_v4 = vld [vmem:[#allocation7] ss:$0 sm:$0xff]  ;;  %vm138_vm2 = vcmask 781312   ;;  %s291_s2 = smov [#allocation8]  }
  0x39   :  { %172 = vmatpush3.bf16.msra.mxu0 %v187_v1  ;;  %s146_s22 = sshll.u32 %s291_s2, 4  ;;  %s147_s22 = int_to_ptr.vmem [resolvable:$true] %s146_s22 }
  0x3a   :  { %173 = vmatprep.subr.bf16.mxu0 %v289_v0  ;;  %s256_s23 = scalar_lea.vmem %s147_s22, 128  ;;  %p261_p11 = scmp.lt.s32.totalorder %s147_s22, %s147_s22 }
  0x3b   :  { %p257_p10 = scmp.ne.s32.totalorder %s147_s22, %s256_s23  ;;  %p262_p12 = scmp.lt.s32.totalorder %s256_s23, %s256_s23 }
  0x3d   :  { %174 = vmatpush3.bf16.msra.mxu0 %v188_v2  ;;  %p263_p13 = por %p262_p12, %p261_p11 }
  0x3f   :  { %p264_p0 = pnand %p263_p13, %p257_p10 }
  0x40   :  { %176 = vmatmul.mubr.msk.bf16.vlgmr.msra.gmra.mrb[0].mxu0 %vm85_vm1, %v189_v3 }
 0x113   :  { %v123_v5 = vpop.f32.mrb[0].mxu0 }
 0x114   :  { %v124_v6 = vadd.f32 %v159_v4, %v123_v5  ;;  %v177_v7 = vpop.f32.mrb[1].mxu0 }
 0x115   :  { %v126_v8 = vpop.f32.mrb[2].mxu0 }
 0x116   :  { %v166_v9 = vpack.c.bf16 %v124_v6, %v124_v6  ;;  %v127_v10 = vadd.f32 %v159_v4, %v126_v8  ;;  %v178_v11 = vpop.f32.mrb[3].mxu0 }
 0x118   :  { %v167_v12 = vpack.c.bf16 %v127_v10, %v127_v10  ;;  %139 = vst.msk [vmem:[#allocation8] sm:$0xf] %vm138_vm2, %v166_v9 }
 0x11a   :  { %140 = vst.msk [vmem:[#allocation8 + $0x4] sm:$0xf] %vm138_vm2, %v167_v12 }
 0x11b   :  { %267 = shalt.err (!%p264_p0)
}
 0x11c   :  { %s268_s28 = scalar_lea.hbm %s379_s3, 128 }
 0x11d   :  { %p269_p1 = scmp.ne.s32.totalorder %s379_s3, %s268_s28  ;;  %p272_p2 = scmp.lt.u32.totalorder %s268_s28, %s379_s3 }
 0x11f   :  { %p274_p3 = pnand %p272_p2, %p269_p1 }
 0x121   :  { %277 = shalt.err (!%p274_p3)
}
 0x122   :  { %152 = dma.vmem_to_hbm [thread:$0]  %s147_s22, 128, %s379_s3, [#allocation4], %s286_s24, %s286_s24, %s287_s25  }
 0x123   :  { %282 = dma.done.wait [#allocation4], 128  }
 0x124   :  { %283 = vsyncadd [#allocation4], 4294967168 }
 0x125   :  { %156 = vsyncpa [#allocation3], 1 }
 0x126   :  { %157 = vsyncpa [#allocation6], 1 }
 0x127   :  { %158 = vsyncpa [#allocation4], 1 }

// kernel: _lambda_.16
= control target key start
LH: loop header
LB: loop body
LE: loop exit
PB: predicated region body
PF: predicated region fallthrough
CT: control target
= control target key end

     0   :  { %7 = vsyncpa [#allocation3], 0  ;;  %s1067_s0 = inlined_call_operand.hbm [shape: bf16[2,8,96], index: 0, kind: input, shape index: {}]   ;;  %s1068_s1 = inlined_call_operand.hbm [shape: f32[2,1,8], index: 1, kind: input, shape index: {}]   ;;  %s1069_s2 = inlined_call_operand.hbm [shape: bf16[2,8,32], index: 2, kind: output, shape index: {}]  }
   0x1   :  { %9 = vsyncpa [#allocation3 + $0x1], 0 }
   0x2   :  { %10 = vsyncpa [#allocation6], 0 }
   0x3   :  { %12 = vsyncpa [#allocation6 + $0x1], 0 }
   0x4   :  { %13 = vsyncpa [#allocation4], 0 }
   0x5   :  { %15 = vsyncpa [#allocation4 + $0x1], 0  ;;  %s834_s9 = smov 0   ;;  %s836_s10 = smov 0  }
   0x6   :  { %s838_s11 = smov 0   ;;  %s840_s12 = smov 0  }
   0x7 LB: > { %s855_s13 = sadd.s32 4294967295, %s806_s12   ;;  %s553_s14 = sadd.s32 4294967294, %s806_s12   ;;  %s806_s12 = sphi %s840_s12, %s1088_s12   ;;  %s802_s11 = sphi %s838_s11, %s1087_s11   ;;  %s798_s10 = sphi %s836_s10, %s1086_s10   ;;  %s794_s9 = sphi %s834_s9, %s1085_s9  }
   0x8   : > { %s859_s15 = sadd.s32 1, %s806_s12   ;;  %s28_s16 = sadd.s32 1, %s802_s11 }
   0x9   : > { %s25_s17 = ssub.s32 %s806_s12, %s859_s15  ;;  %p35_p0 = scmp.ne.s32.totalorder %s802_s11, %s798_s10 }
   0xa   : > { %p26_p1 = scmp.eq.s32.totalorder %s25_s17, 0  ;;  %p36_p2 = scmp.eq.s32.totalorder %s806_s12, 0 }
   0xb   : > { %p41_p3 = scmp.ne.s32.totalorder %s798_s10, %s794_s9  ;;  %p42_p4 = scmp.eq.s32.totalorder %s855_s13, 0 }
   0xc   : > { %s871_s18 = scalar_select %p26_p1, %s802_s11, %s28_s16  }
   0xd   : > { %p873_p5 = por %p36_p2, %p35_p0  ;;  %p877_p6 = por %p42_p4, %p41_p3 }
   0xe   : > { %p91_p7 = scmp.eq.s32.totalorder %s855_s13, 1  ;;  %p97_p8 = scmp.eq.s32.totalorder %s553_s14, 1 }
   0xf   : > { %s1073_s20 = scalar_select %p877_p6, 1, 0 }
  0x10   : > { %p624_p10 = scmp.lt.s32.totalorder %s806_s12, 2  ;;  %p884_p11 = por %p91_p7, %p35_p0 }
  0x11   : > { %p888_p12 = por %p97_p8, %p41_p3  ;;  %s893_s23 = sand.u32 1, %s802_s11  }
  0x12   : > { %s1074_s21 = scalar_select %p884_p11, 1, 0 }
  0x13   : > { %s1075_s22 = scalar_select %p888_p12, 1, 0 }
  0x14   : > { %s557_s24 = sshll.u32 %s806_s12, 6  ;;  %s556_s25 = sshll.u32 %s893_s23, 2 }
  0x15   : > { %s900_s28 = scalar_lea.hbm %s1067_s0, %s557_s24  ;;  %s121_s29 = scalar_lea.vmem [#allocation2], %s556_s25 }
  0x16   : > { %s128_s30 = sshll.u32 %s121_s29, 4  ;;  %p904_p13 = pnand %p624_p10, %p873_p5  ;;  %s908_s30 = int_to_ptr.vmem [resolvable:$true] %s128_s30 }
  0x17   : > { %s118_s4 = scalar_lea.sflag [#allocation3], %s893_s23  ;;  %s676_s5 = scalar_lea.hbm %s900_s28, 64 }
  0x18   : > { %p677_p2 = scmp.ne.s32.totalorder %s900_s28, %s676_s5  ;;  %p678_p3 = pneg %p904_p13 }
  0x19   : > { %s681_s8 = scalar_lea.hbm %s1067_s0, 128  ;;  %p682_p5 = scmp.lt.u32.totalorder %s900_s28, %s1067_s0 }
  0x1a   : > { %p679_p4 = pnand %p678_p3, %p677_p2  ;;  %p683_p8 = scmp.lt.u32.totalorder %s681_s8, %s676_s5 }
  0x1b   : > { %p685_p9 = scmp.lt.u32.totalorder %s676_s5, %s900_s28 }
  0x1c   : > { %p680_p7 = pneg %p679_p4  ;;  %p684_p10 = por %p683_p8, %p682_p5 }
  0x1e   : > { %p686_p0 = por %p685_p9, %p684_p10 }
  0x20   : > { %p687_p1 = pnand %p686_p0, %p680_p7 }
  0x22   : > { %690 = shalt.err (!%p687_p1)
}
  0x23   : > { %s691_s17 = scalar_lea.vmem %s908_s30, 64  ;;  %s808_s19 = smov [#allocation2]  }
  0x24   : > { %p692_p2 = scmp.ne.s32.totalorder %s908_s30, %s691_s17  ;;  %s696_s24 = sshll.u32 %s808_s19, 4  ;;  %s697_s24 = int_to_ptr.vmem [resolvable:$false] %s696_s24 }
  0x25   : > { %s698_s25 = scalar_lea.vmem %s697_s24, 128  ;;  %p699_p11 = scmp.lt.s32.totalorder %s908_s30, %s697_s24 }
  0x26   : > { %p694_p4 = pnand %p692_p2, %p678_p3  ;;  %p700_p5 = scmp.lt.s32.totalorder %s698_s25, %s691_s17 }
  0x28   : > { %p695_p12 = pneg %p694_p4  ;;  %p701_p8 = por %p700_p5, %p699_p11 }
  0x2a   : > { %p702_p9 = pnand %p701_p8, %p695_p12 }
  0x2c   : > { %705 = shalt.err (!%p702_p9)
}
  0x2d   : > { %616 = dma.hbm_to_vmem [thread:$0]  (!%p904_p13), %s900_s28, 64, %s908_s30, %s118_s4  }
  0x2e   : > { %p1077_p0 = scmp.lt.s32.totalorder %s806_s12, 3  ;;  %p1078_p1 = scmp.ge.s32.totalorder %s806_s12, 1 }
  0x2f   : > { %s558_s27 = sshll.u32 %s806_s12, 4  ;;  %s138_s7 = scalar_lea.vmem [#allocation5], %s893_s23 }
  0x30   : > { %p942_p7 = pnand %p1078_p1, %p1077_p0  ;;  %s950_s6 = scalar_lea.hbm %s1068_s1, %s558_s27 }
  0x31   : > { %s145_s8 = sshll.u32 %s138_s7, 4  ;;  %s136_s28 = scalar_lea.sflag [#allocation6], %s893_s23  ;;  %s146_s8 = int_to_ptr.vmem [resolvable:$true] %s145_s8 }
  0x32   : > { %s1079_s26 = scalar_select %p942_p7, 1, 0 }
  0x33   : > { %s706_s30 = scalar_lea.hbm %s950_s6, 16  ;;  %s711_s16 = scalar_lea.hbm %s1068_s1, 32 }
  0x34   : > { %p707_p11 = scmp.ne.s32.totalorder %s950_s6, %s706_s30  ;;  %p712_p2 = scmp.lt.u32.totalorder %s950_s6, %s1068_s1 }
  0x35   : > { %p713_p4 = scmp.lt.u32.totalorder %s711_s16, %s706_s30  ;;  %p715_p8 = scmp.lt.u32.totalorder %s706_s30, %s950_s6 }
  0x36   : > { %p709_p12 = pnand %p707_p11, %p678_p3 }
  0x37   : > { %p714_p5 = por %p713_p4, %p712_p2 }
  0x38   : > { %p710_p10 = pneg %p709_p12 }
  0x39   : > { %p716_p9 = por %p715_p8, %p714_p5 }
  0x3b   : > { %p717_p0 = pnand %p716_p9, %p710_p10 }
  0x3d   : > { %720 = shalt.err (!%p717_p0)
}
  0x3e   : > { %s721_s23 = scalar_lea.vmem %s146_s8, 16  ;;  %s809_s24 = smov [#allocation5]  }
  0x3f   : > { %p722_p1 = scmp.ne.s32.totalorder %s146_s8, %s721_s23  ;;  %s726_s25 = sshll.u32 %s809_s24, 4  ;;  %s727_s25 = int_to_ptr.vmem [resolvable:$false] %s726_s25 }
  0x40   : > { %s728_s27 = scalar_lea.vmem %s727_s25, 32  ;;  %p729_p6 = scmp.lt.s32.totalorder %s146_s8, %s727_s25 }
  0x41   : > { %p724_p11 = pnand %p722_p1, %p678_p3  ;;  %p730_p7 = scmp.lt.s32.totalorder %s728_s27, %s721_s23 }
  0x43   : > { %p725_p12 = pneg %p724_p11  ;;  %p731_p2 = por %p730_p7, %p729_p6 }
  0x45   : > { %p732_p4 = pnand %p731_p2, %p725_p12 }
  0x47   : > { %735 = shalt.err (!%p732_p4)
}
  0x48   : > { %619 = dma.hbm_to_vmem [thread:$0]  (!%p904_p13), %s950_s6, 16, %s146_s8, %s136_s28  }
  0x49   : > { %p1080_p10 = scmp.ne.s32.totalorder %s1079_s26, 0 }
  0x4a   : > { %s976_s29 = sand.u32 (!%p1080_p10), 1, %s798_s10   ;;  %p1081_p6 = scmp.ne.s32.totalorder (!%p1080_p10), %s1073_s20, 0 }
  0x4b   : > { %154 = sbr.rel (%p1080_p10) target bundleno = 1622 (0x656), region = 28  ;;  %s560_s5 = sshll.u32 (!%p1080_p10), %s976_s29, 2 }
  0x4c   : > { %s157_s7 = scalar_lea.sflag (!%p1080_p10), [#allocation3], %s976_s29  ;;  %s982_s30 = scalar_lea.vmem (!%p1080_p10), [#allocation2], %s560_s5 }
  0x52   : > { %781 = dma.done.wait (%p1081_p6), %s157_s7, 64  }
  0x53   : > { %783 = vsyncadd (%p1081_p6), %s157_s7, 4294967232  ;;  %s166_s3 = scalar_lea.sflag [#allocation6], %s976_s29  ;;  %s168_s26 = scalar_lea.vmem [#allocation5], %s976_s29 }
  0x54   : > { %785 = dma.done.wait (%p1081_p6), %s166_s3, 16  }
  0x55   : > { %787 = vsyncadd (%p1081_p6), %s166_s3, 4294967280  ;;  %v810_v0 = vmov 0.0   ;;  %vm811_vm0 = vmmov 0   ;;  %v195_v1 = vld [vmem:[%s982_s30] sm:$0xf]  ;;  %s812_s6 = smov 96  }
  0x56   : > { %583 = vmatprep.subr.bf16.mxu0 %v810_v0  ;;  %585 = vmatprep.mubr.msk.bf16.mxu0 %vm811_vm0, %v810_v0  ;;  %v563_v2 = vcombine.low %v195_v1, %v195_v1  ;;  %v196_v3 = vunpack.c.l.bf16 %v195_v1  ;;  %vm210_vm1 = vcmask 130048   ;;  %s813_s20 = smov 64   ;;  %v562_v8 = vld [vmem:[%s168_s26] ss:$0 sm:$0xff]  ;;  %vm257_vm2 = vcmask 64512   ;;  %s814_s8 = smov 80  }
  0x57   : > { %589 = vmatprep.subr.bf16.mxu1 %v810_v0  ;;  %591 = vmatprep.mubr.msk.bf16.mxu1 %vm811_vm0, %v810_v0  ;;  %vm275_vm3 = vcmask 1043456   ;;  %v322_v22 = vld [vmem:[%s982_s30] sm:$0xf]  ;;  %s815_s28 = smov 112   ;;  %vm320_vm4 = vcmask 125952   ;;  %s1010_s4 = scalar_lea.vmem [#allocation7], %s560_s5 }
  0x58   : > { %208 = vrot.lane.b32.xlu0 %v563_v2, %s812_s6  ;;  %v197_v5 = vmul.f32 0.25, %v196_v3  ;;  %270 = vrot.lane.b32.xlu1 %v563_v2, %s813_s20  ;;  %v323_v23 = vunpack.c.l.bf16 %v322_v22  ;;  %v566_v24 = vcombine.low %v322_v22, %v322_v22  ;;  %s816_s14 = smov 48   ;;  %s817_s16 = smov 16   ;;  %vm447_vm5 = vcmask 257152  }
  0x59   : > { %s571_s17 = sshll.u32 %s855_s13, 6  ;;  %s463_s19 = sshll.u32 %s1010_s4, 4  ;;  %s1024_s19 = int_to_ptr.vmem [resolvable:$true] %s463_s19 }
  0x5a   : > { %v198_v7 = vpack.c.bf16 %v197_v5, %v197_v5  ;;  %v324_v25 = vmul.f32 0.25, %v323_v23  ;;  %s1022_s25 = scalar_lea.hbm %s1069_s2, %s571_s17  ;;  %s450_s27 = scalar_lea.sflag [#allocation4], %s976_s29 }
  0x5b   : > { %s736_s5 = scalar_lea.vmem %s1024_s19, 64  ;;  %p1082_p3 = scmp.ne.s32.totalorder %s1074_s21, 0 }
  0x5c   : > { %v325_v26 = vpack.c.bf16 %v324_v25, %v324_v25  ;;  %p737_p13 = scmp.ne.s32.totalorder %s1024_s19, %s736_s5  ;;  %s818_s13 = smov [#allocation7]  }
  0x5d   : > { %s740_s7 = sshll.u32 %s818_s13, 4  ;;  %s741_s7 = int_to_ptr.vmem [resolvable:$false] %s740_s7 }
  0x5e   : > { %p738_p7 = pnand %p737_p13, %p1082_p3  ;;  %s742_s30 = scalar_lea.vmem %s741_s7, 128 }
  0x5f   : > { %p743_p8 = scmp.lt.s32.totalorder %s1024_s19, %s741_s7  ;;  %p744_p9 = scmp.lt.s32.totalorder %s742_s30, %s736_s5 }
  0x60   : > { %p739_p5 = pneg %p738_p7 }
  0x61   : > { %p745_p0 = por %p744_p9, %p743_p8 }
  0x63   : > { %p746_p1 = pnand %p745_p0, %p739_p5 }
  0xca   : > { %v209_v4 = vpop.permute.xlu0 %208  ;;  %v271_v15 = vpop.permute.xlu1 %270 }
  0xcb   : > { %v215_v6 = vsel %vm210_vm1, %v209_v4, 0  ;;  %v277_v16 = vsel %vm275_vm3, %v271_v15, 0 }
  0xcc   : > { %584 = vmatpush3.bf16.xpose.msra.mxu0 %v215_v6  ;;  %590 = vmatpush3.bf16.msra.mxu1 %v277_v16 }
  0xcd   : > { %601 = vmatprep.subr.bf16.mxu0 %v810_v0  ;;  %595 = vmatprep.subr.bf16.mxu1 %v810_v0 }
  0xd3   : > { %586 = vmatmul.mubr.msk.bf16.vlgmr.msra.gmra.mrb[0].mxu0 %vm210_vm1, %v198_v7 }
  0xd4   : > { %603 = vmatprep.mubr.msk.bf16.mxu0 %vm811_vm0, %v810_v0 }
 0x1a6   : > { %v251_v9 = vpop.f32.mrb[0].mxu0 }
 0x1a7   : > { %v252_v10 = vadd.f32 %v562_v8, %v251_v9  ;;  %v587_v11 = vpop.f32.mrb[1].mxu0 }
 0x1a8   : > { %v254_v12 = vpop.f32.mrb[2].mxu0 }
 0x1a9   : > { %v588_v13 = vpop.f32.mrb[3].mxu0  ;;  %v258_v14 = vsel %vm257_vm2, %v252_v10, -inf }
 0x1aa   : > { %259 = vmax.xlane.f32.xlu0 %v258_v14 }
 0x237   : > { %v260_v17 = vpop.xlane.xlu0 %259 }
 0x238   : > { %v261_v18 = vsub.f32 %v252_v10, %v260_v17 }
 0x23a   : > { %v262_v19 = vmul.f32 1.442695, %v261_v18 }
 0x23c   : > { %668 = vpow2.f32 %v262_v19 }
 0x246   : > { %v669_v20 = vpop.eup %668 }
 0x247   : > { %v264_v21 = vsel %vm257_vm2, %v669_v20, 0.0 }
 0x248   : > { %265 = vadd.xlane.f32.xlu1 %v264_v21 }
 0x259   : > { %332 = vrot.lane.b32.xlu1 %v566_v24, %s814_s8 }
 0x25d   : > { %327 = vrot.lane.b32.xlu1 %v325_v26, %s815_s28 }
 0x2d5   : > { %v266_v27 = vpop.xlane.xlu1 %265 }
 0x2d6   : > { %670 = vrcp.f32 %v266_v27 }
 0x2d9   : > { %v333_v29 = vpop.permute.xlu1 %332 }
 0x2da   : > { %v338_v31 = vsel %vm210_vm1, %v333_v29, 0 }
 0x2dd   : > { %v328_v33 = vpop.permute.xlu1 %327 }
 0x2e0   : > { %v671_v28 = vpop.eup %670 }
 0x2e1   : > { %v268_v30 = vmul.f32 %v671_v28, %v669_v20 }
 0x2e3   : > { %v269_v32 = vpack.c.bf16 %v268_v30, %v268_v30 }
 0x2e5   : > { %592 = vmatmul.mubr.msk.bf16.vlgmr.msra.gmra.mrb[0].mxu1 %vm257_vm2, %v269_v32 }
 0x2e6   : > { %596 = vmatpush3.bf16.xpose.msra.mxu1 %v338_v31  ;;  %597 = vmatprep.mubr.msk.bf16.mxu1 %vm811_vm0, %v810_v0 }
 0x2ed   : > { %598 = vmatmul.mubr.msk.bf16.vlgmr.msra.gmra.mrb[4].mxu1 %vm210_vm1, %v328_v33 }
 0x3b8   : > { %v313_v34 = vpop.f32.mrb[0].mxu1 }
 0x3b9   : > { %v319_v35 = vpack.c.bf16 %v313_v34, %v313_v34  ;;  %v593_v36 = vpop.f32.mrb[1].mxu1 }
 0x3ba   : > { %v316_v37 = vpop.f32.mrb[2].mxu1 }
 0x3bb   : > { %v594_v38 = vpop.f32.mrb[3].mxu1  ;;  %321 = vst.msk [vmem:[%s1010_s4] sm:$0xf] %vm320_vm4, %v319_v35 }
 0x3c0   : > { %v374_v39 = vpop.f32.mrb[4].mxu1 }
 0x3c1   : > { %v375_v40 = vadd.f32 %v562_v8, %v374_v39  ;;  %v599_v41 = vpop.f32.mrb[5].mxu1 }
 0x3c2   : > { %v377_v42 = vpop.f32.mrb[6].mxu1 }
 0x3c3   : > { %v600_v43 = vpop.f32.mrb[7].mxu1  ;;  %v380_v44 = vsel %vm257_vm2, %v375_v40, -inf }
 0x3c4   : > { %381 = vmax.xlane.f32.xlu1 %v380_v44 }
 0x451   : > { %v382_v45 = vpop.xlane.xlu1 %381 }
 0x452   : > { %v383_v46 = vsub.f32 %v375_v40, %v382_v45 }
 0x454   : > { %v384_v47 = vmul.f32 1.442695, %v383_v46 }
 0x456   : > { %672 = vpow2.f32 %v384_v47 }
 0x460   : > { %v673_v48 = vpop.eup %672 }
 0x461   : > { %v386_v49 = vsel %vm257_vm2, %v673_v48, 0.0 }
 0x462   : > { %387 = vadd.xlane.f32.xlu0 %v386_v49 }
 0x478   : > { %392 = vrot.lane.b32.xlu0 %v566_v24, %s816_s14 }
 0x4ef   : > { %v388_v50 = vpop.xlane.xlu0 %387 }
 0x4f0   : > { %674 = vrcp.f32 %v388_v50 }
 0x4f3   : > { %v393_v51 = vpop.permute.xlu0 %392 }
 0x4f4   : > { %v398_v52 = vsel %vm275_vm3, %v393_v51, 0 }
 0x4f5   : > { %602 = vmatpush3.bf16.msra.mxu0 %v398_v52 }
 0x4fa   : > { %v675_v53 = vpop.eup %674 }
 0x4fb   : > { %v390_v54 = vmul.f32 %v675_v53, %v673_v48 }
 0x4fd   : > { %v391_v55 = vpack.c.bf16 %v390_v54, %v390_v54 }
 0x4ff   : > { %604 = vmatmul.mubr.msk.bf16.vlgmr.msra.gmra.mrb[4].mxu0 %vm257_vm2, %v391_v55 }
 0x5d2   : > { %v434_v56 = vpop.f32.mrb[4].mxu0 }
 0x5d3   : > { %v574_v57 = vpack.c.bf16 %v434_v56, %v434_v56  ;;  %v605_v58 = vpop.f32.mrb[5].mxu0 }
 0x5d4   : > { %v437_v59 = vpop.f32.mrb[6].mxu0 }
 0x5d5   : > { %444 = vrot.lane.b32.xlu0 %v574_v57, %s817_s16  ;;  %v606_v60 = vpop.f32.mrb[7].mxu0 }
 0x647   : > { %v445_v61 = vpop.permute.xlu0 %444 }
 0x648   : > { %448 = vst.msk [vmem:[%s1010_s4] sm:$0xf] %vm447_vm5, %v445_v61 }
 0x649   : > { %749 = shalt.err (!%p746_p1)
}
 0x64a   : > { %s750_s29 = scalar_lea.hbm %s1022_s25, 64  ;;  %s754_s6 = scalar_lea.hbm %s1069_s2, 128 }
 0x64b   : > { %p751_p11 = scmp.ne.s32.totalorder %s1022_s25, %s750_s29  ;;  %p755_p4 = scmp.lt.u32.totalorder %s1022_s25, %s1069_s2 }
 0x64c   : > { %p756_p10 = scmp.lt.u32.totalorder %s754_s6, %s750_s29  ;;  %p758_p13 = scmp.lt.u32.totalorder %s750_s29, %s1022_s25 }
 0x64d   : > { %p752_p12 = pnand %p751_p11, %p1082_p3 }
 0x64e   : > { %p757_p6 = por %p756_p10, %p755_p4 }
 0x64f   : > { %p753_p2 = pneg %p752_p12 }
 0x650   : > { %p759_p7 = por %p758_p13, %p757_p6 }
 0x652   : > { %p760_p5 = pnand %p759_p7, %p753_p2 }
 0x654   : > { %763 = shalt.err (!%p760_p5)
}
 0x655   : > { %611 = dma.vmem_to_hbm [thread:$0]  (%p1082_p3), %s1024_s19, 64, %s1022_s25, %s450_s27  }
 0x656 PF: > { %s475_s28 = sand.u32 1, %s794_s9   ;;  %p1083_p8 = scmp.ne.s32.totalorder %s1075_s22, 0 }
 0x657   : > { %p1084_p9 = scmp.ge.s32.totalorder %s806_s12, 2  ;;  %s476_s4 = scalar_lea.sflag [#allocation4], %s475_s28 }
 0x659   : > { %p621_p0 = pnand %p1084_p9, %p1083_p8 }
 0x65b   : > { %789 = dma.done.wait (!%p621_p0), %s476_s4, 64  }
 0x65c   : > { %791 = vsyncadd (!%p621_p0), %s476_s4, 4294967232  ;;  %p18_p1 = scmp.ge.s32.totalorder %s859_s15, 4   ;;  %s1085_s9 = smov %s798_s10 }
 0x65d   : > { %s1086_s10 = smov %s802_s11  ;;  %s1087_s11 = smov %s871_s18 }
 0x65e   : > { %s1088_s12 = smov %s859_s15  ;;  %20 = sbr.rel (!%p18_p1) target bundleno = 7 (0x7), region = 86 }
 0x665   :  { %481 = vsyncpa [#allocation3], 1 }
 0x666   :  { %483 = vsyncpa [#allocation3 + $0x1], 1 }
 0x667   :  { %484 = vsyncpa [#allocation6], 1 }
 0x668   :  { %486 = vsyncpa [#allocation6 + $0x1], 1 }
 0x669   :  { %487 = vsyncpa [#allocation4], 1 }
 0x66a   :  { %489 = vsyncpa [#allocation4 + $0x1], 1 }

// kernel: _lambda_.17
= control target key start
LH: loop header
LB: loop body
LE: loop exit
PB: predicated region body
PF: predicated region fallthrough
CT: control target
= control target key end

     0   :  { %11 = vsyncpa [#allocation3], 0  ;;  %s620_s0 = inlined_call_operand.hbm [shape: bf16[16,32], index: 0, kind: input, shape index: {}]   ;;  %s621_s1 = inlined_call_operand.hbm [shape: bf16[32,32], index: 1, kind: input, shape index: {}]   ;;  %s622_s2 = inlined_call_operand.hbm [shape: f32[1,32], index: 2, kind: input, shape index: {}]   ;;  %s623_s3 = inlined_call_operand.hbm [shape: bf16[16,32], index: 3, kind: input, shape index: {}]   ;;  %s624_s4 = inlined_call_operand.hbm [shape: f32[1,32], index: 4, kind: input, shape index: {}]   ;;  %s625_s5 = inlined_call_operand.hbm [shape: f32[1,32], index: 5, kind: input, shape index: {}]   ;;  %s626_s6 = inlined_call_operand.hbm [shape: bf16[16,32], index: 6, kind: output, shape index: {}]  }
   0x1   :  { %12 = vsyncpa [#allocation6], 0 }
   0x2   :  { %13 = vsyncpa [#allocation9], 0 }
   0x3   :  { %14 = vsyncpa [#allocation12], 0 }
   0x4   :  { %15 = vsyncpa [#allocation4], 0  ;;  %s466_s21 = smov [#allocation5]   ;;  %s467_s23 = smov [#allocation8]  }
   0x5   :  { %s33_s22 = sshll.u32 %s466_s21, 4  ;;  %s55_s24 = sshll.u32 %s467_s23, 4  ;;  %s34_s22 = int_to_ptr.vmem [resolvable:$true] %s33_s22  ;;  %s512_s24 = int_to_ptr.vmem [resolvable:$true] %s55_s24 }
   0x6   :  { %s302_s27 = scalar_lea.hbm %s621_s1, 256 }
   0x7   :  { %p303_p0 = scmp.ne.s32.totalorder %s621_s1, %s302_s27  ;;  %p306_p1 = scmp.lt.u32.totalorder %s302_s27, %s621_s1 }
   0x9   :  { %p308_p2 = pnand %p306_p1, %p303_p0 }
   0xb   :  { %311 = shalt.err (!%p308_p2)
}
   0xc   :  { %s312_s8 = scalar_lea.vmem %s34_s22, 256  ;;  %p317_p4 = scmp.lt.s32.totalorder %s34_s22, %s34_s22 }
   0xd   :  { %p313_p3 = scmp.ne.s32.totalorder %s34_s22, %s312_s8  ;;  %p318_p5 = scmp.lt.s32.totalorder %s312_s8, %s312_s8 }
   0xf   :  { %p319_p6 = por %p318_p5, %p317_p4 }
  0x11   :  { %p320_p7 = pnand %p319_p6, %p313_p3 }
  0x13   :  { %323 = shalt.err (!%p320_p7)
}
  0x14   :  { %s468_s9 = smov 64   ;;  %s469_s10 = smov 4  }
  0x15   :  { %39 = dma.hbm_to_vmem [thread:$0]  %s621_s1, 256, %s34_s22, [#allocation6], %s468_s9, %s468_s9, %s469_s10  }
  0x16   :  { %s324_s15 = scalar_lea.hbm %s623_s3, 128 }
  0x17   :  { %p325_p8 = scmp.ne.s32.totalorder %s623_s3, %s324_s15  ;;  %p328_p9 = scmp.lt.u32.totalorder %s324_s15, %s623_s3 }
  0x19   :  { %p330_p10 = pnand %p328_p9, %p325_p8 }
  0x1b   :  { %333 = shalt.err (!%p330_p10)
}
  0x1c   :  { %s334_s20 = scalar_lea.vmem %s512_s24, 128  ;;  %p339_p12 = scmp.lt.s32.totalorder %s512_s24, %s512_s24 }
  0x1d   :  { %p335_p11 = scmp.ne.s32.totalorder %s512_s24, %s334_s20  ;;  %p340_p13 = scmp.lt.s32.totalorder %s334_s20, %s334_s20 }
  0x1f   :  { %p341_p0 = por %p340_p13, %p339_p12 }
  0x21   :  { %p342_p1 = pnand %p341_p0, %p335_p11 }
  0x23   :  { %345 = shalt.err (!%p342_p1)
}
  0x24   :  { %61 = dma.hbm_to_vmem [thread:$0]  %s623_s3, 128, %s512_s24, [#allocation9], %s468_s9, %s468_s9, %s469_s10  }
  0x25   :  { %s470_s22 = smov [#allocation2]   ;;  %s471_s25 = smov [#allocation7]  }
  0x26   :  { %s21_s23 = sshll.u32 %s470_s22, 4  ;;  %s46_s26 = sshll.u32 %s471_s25, 4  ;;  %s22_s23 = int_to_ptr.vmem [resolvable:$true] %s21_s23  ;;  %s47_s26 = int_to_ptr.vmem [resolvable:$true] %s46_s26 }
  0x27   :  { %s346_s29 = scalar_lea.hbm %s620_s0, 128 }
  0x28   :  { %p347_p2 = scmp.ne.s32.totalorder %s620_s0, %s346_s29  ;;  %p350_p3 = scmp.lt.u32.totalorder %s346_s29, %s620_s0 }
  0x2a   :  { %p352_p4 = pnand %p350_p3, %p347_p2 }
  0x2c   :  { %355 = shalt.err (!%p352_p4)
}
  0x2d   :  { %s356_s3 = scalar_lea.vmem %s22_s23, 128  ;;  %p361_p6 = scmp.lt.s32.totalorder %s22_s23, %s22_s23 }
  0x2e   :  { %p357_p5 = scmp.ne.s32.totalorder %s22_s23, %s356_s3  ;;  %p362_p7 = scmp.lt.s32.totalorder %s356_s3, %s356_s3 }
  0x30   :  { %p363_p8 = por %p362_p7, %p361_p6 }
  0x32   :  { %p364_p9 = pnand %p363_p8, %p357_p5 }
  0x34   :  { %367 = shalt.err (!%p364_p9)
}
  0x35   :  { %27 = dma.hbm_to_vmem [thread:$0]  %s620_s0, 128, %s22_s23, [#allocation3], %s468_s9, %s468_s9, %s469_s10  }
  0x36   :  { %s368_s15 = scalar_lea.hbm %s622_s2, 16 }
  0x37   :  { %p369_p10 = scmp.ne.s32.totalorder %s622_s2, %s368_s15  ;;  %p372_p11 = scmp.lt.u32.totalorder %s368_s15, %s622_s2 }
  0x39   :  { %p374_p12 = pnand %p372_p11, %p369_p10 }
  0x3b   :  { %377 = shalt.err (!%p374_p12)
}
  0x3c   :  { %s378_s20 = scalar_lea.vmem %s47_s26, 16  ;;  %s382_s1 = scalar_lea.vmem %s47_s26, 32 }
  0x3d   :  { %p379_p13 = scmp.ne.s32.totalorder %s47_s26, %s378_s20  ;;  %p383_p0 = scmp.lt.s32.totalorder %s47_s26, %s47_s26 }
  0x3e   :  { %p384_p1 = scmp.lt.s32.totalorder %s382_s1, %s378_s20 }
  0x40   :  { %p385_p2 = por %p384_p1, %p383_p0 }
  0x42   :  { %p386_p3 = pnand %p385_p2, %p379_p13 }
  0x44   :  { %389 = shalt.err (!%p386_p3)
}
  0x45   :  { %49 = dma.hbm_to_vmem [thread:$0]  %s622_s2, 16, %s47_s26, [#allocation6]  }
  0x46   :  { %s472_s22 = smov [#allocation10]   ;;  %s473_s25 = smov [#allocation11]  }
  0x47   :  { %s68_s23 = sshll.u32 %s472_s22, 4  ;;  %s78_s27 = sshll.u32 %s473_s25, 4  ;;  %s69_s23 = int_to_ptr.vmem [resolvable:$true] %s68_s23  ;;  %s79_s27 = int_to_ptr.vmem [resolvable:$true] %s78_s27 }
  0x48   :  { %s390_s30 = scalar_lea.hbm %s624_s4, 16 }
  0x49   :  { %p391_p4 = scmp.ne.s32.totalorder %s624_s4, %s390_s30  ;;  %p394_p5 = scmp.lt.u32.totalorder %s390_s30, %s624_s4 }
  0x4b   :  { %p396_p6 = pnand %p394_p5, %p391_p4 }
  0x4d   :  { %399 = shalt.err (!%p396_p6)
}
  0x4e   :  { %s400_s2 = scalar_lea.vmem %s69_s23, 16  ;;  %s404_s26 = scalar_lea.vmem %s69_s23, 32 }
  0x4f   :  { %p401_p7 = scmp.ne.s32.totalorder %s69_s23, %s400_s2  ;;  %p405_p8 = scmp.lt.s32.totalorder %s69_s23, %s69_s23 }
  0x50   :  { %p406_p9 = scmp.lt.s32.totalorder %s404_s26, %s400_s2 }
  0x52   :  { %p407_p10 = por %p406_p9, %p405_p8 }
  0x54   :  { %p408_p11 = pnand %p407_p10, %p401_p7 }
  0x56   :  { %411 = shalt.err (!%p408_p11)
}
  0x57   :  { %71 = dma.hbm_to_vmem [thread:$0]  %s624_s4, 16, %s69_s23, [#allocation9]  }
  0x58   :  { %s412_s15 = scalar_lea.hbm %s625_s5, 16 }
  0x59   :  { %p413_p12 = scmp.ne.s32.totalorder %s625_s5, %s412_s15  ;;  %p416_p13 = scmp.lt.u32.totalorder %s412_s15, %s625_s5 }
  0x5b   :  { %p418_p0 = pnand %p416_p13, %p413_p12 }
  0x5d   :  { %421 = shalt.err (!%p418_p0)
}
  0x5e   :  { %s422_s20 = scalar_lea.vmem %s79_s27, 16  ;;  %s426_s1 = scalar_lea.vmem %s79_s27, 32 }
  0x5f   :  { %p423_p1 = scmp.ne.s32.totalorder %s79_s27, %s422_s20  ;;  %p427_p2 = scmp.lt.s32.totalorder %s79_s27, %s79_s27 }
  0x60   :  { %p428_p3 = scmp.lt.s32.totalorder %s426_s1, %s422_s20 }
  0x62   :  { %p429_p4 = por %p428_p3, %p427_p2 }
  0x64   :  { %p430_p5 = pnand %p429_p4, %p423_p1 }
  0x66   :  { %433 = shalt.err (!%p430_p5)
}
  0x67   :  { %81 = dma.hbm_to_vmem [thread:$0]  %s625_s5, 16, %s79_s27, [#allocation12]  }
  0x68   :  { %456 = dma.done.wait [#allocation3], 128  }
  0x69   :  { %457 = vsyncadd [#allocation3], 4294967168 }
  0x6a   :  { %458 = dma.done.wait [#allocation6], 272  }
  0x6b   :  { %459 = vsyncadd [#allocation6], 4294967024 }
  0x6c   :  { %460 = dma.done.wait [#allocation9], 144  }
  0x6d   :  { %461 = vsyncadd [#allocation9], 4294967152 }
  0x6e   :  { %462 = dma.done.wait [#allocation12], 16  }
  0x6f   :  { %463 = vsyncadd [#allocation12], 4294967280  ;;  %v474_v0 = vmov 0.0   ;;  %vm475_vm0 = vmmov 0   ;;  %v295_v1 = vld [vmem:[#allocation5] sm:$0xff]   ;;  %v296_v2 = vld [vmem:[#allocation5 + $0x8] sm:$0xff]  }
  0x70   :  { %276 = vmatprep.subr.bf16.mxu0 %v474_v0  ;;  %280 = vmatprep.mubr.msk.bf16.mxu0 %vm475_vm0, %v474_v0  ;;  %v297_v3 = vld [vmem:[#allocation2] sm:$0xff]   ;;  %vm131_vm1 = vcmask 261120   ;;  %v258_v5 = vld [vmem:[#allocation7] ss:$0 sm:$0xff]  ;;  %vm235_vm2 = vcmask 257024   ;;  %s476_s5 = smov [#allocation13]  }
  0x71   :  { %277 = vmatpush3.bf16.msra.mxu0 %v295_v1  ;;  %v270_v4 = vld [vmem:[#allocation8] sm:$0xff]   ;;  %v263_v35 = vld [vmem:[#allocation10] ss:$0 sm:$0xff]  ;;  %v264_v37 = vld [vmem:[#allocation11] ss:$0 sm:$0xff]  ;;  %s243_s21 = sshll.u32 %s476_s5, 4  ;;  %s244_s21 = int_to_ptr.vmem [resolvable:$true] %s243_s21 }
  0x72   :  { %278 = vmatprep.subr.bf16.mxu0 %v474_v0  ;;  %v271_v6 = vunpack.c.l.bf16 %v270_v4  ;;  %v272_v10 = vunpack.c.h.bf16 %v270_v4  ;;  %s434_s22 = scalar_lea.vmem %s244_s21, 128  ;;  %p439_p7 = scmp.lt.s32.totalorder %s244_s21, %s244_s21 }
  0x73   :  { %p435_p6 = scmp.ne.s32.totalorder %s244_s21, %s434_s22  ;;  %p440_p8 = scmp.lt.s32.totalorder %s434_s22, %s434_s22 }
  0x75   :  { %279 = vmatpush3.bf16.msra.mxu0 %v296_v2  ;;  %p441_p9 = por %p440_p8, %p439_p7 }
  0x77   :  { %p442_p10 = pnand %p441_p9, %p435_p6 }
  0x78   :  { %281 = vmatmul.mubr.msk.bf16.vlgmr.msra.gmra.mrb[0].mxu0 %vm131_vm1, %v297_v3 }
 0x14b   :  { %v169_v7 = vpop.f32.mrb[0].mxu0 }
 0x14c   :  { %v170_v8 = vadd.f32 %v258_v5, %v169_v7  ;;  %v282_v9 = vpop.f32.mrb[1].mxu0 }
 0x14d   :  { %v172_v11 = vpop.f32.mrb[2].mxu0 }
 0x14e   :  { %v173_v12 = vadd.f32 %v258_v5, %v172_v11  ;;  %v283_v13 = vpop.f32.mrb[3].mxu0  ;;  %v180_v14 = vadd.f32 %v271_v6, %v170_v8 }
 0x150   :  { %v182_v15 = vsel %vm131_vm1, %v180_v14, 0.0  ;;  %v181_v16 = vadd.f32 %v272_v10, %v173_v12 }
 0x151   :  { %183 = vadd.xlane.f32.xlu0 %v182_v15 }
 0x152   :  { %v185_v17 = vsel %vm131_vm1, %v181_v16, 0.0 }
 0x155   :  { %186 = vadd.xlane.f32.xlu0 %v185_v17 }
 0x1de   :  { %v184_v18 = vpop.xlane.xlu0 %183 }
 0x1df   :  { %v189_v19 = vmul.f32 0.03125, %v184_v18 }
 0x1e1   :  { %v191_v20 = vsub.f32 %v180_v14, %v189_v19 }
 0x1e2   :  { %v187_v21 = vpop.xlane.xlu0 %186 }
 0x1e3   :  { %v190_v22 = vmul.f32 0.03125, %v187_v21  ;;  %v193_v23 = vmul.f32 %v191_v20, %v191_v20 }
 0x1e5   :  { %v192_v24 = vsub.f32 %v181_v16, %v190_v22  ;;  %v195_v25 = vsel %vm131_vm1, %v193_v23, 0.0 }
 0x1e6   :  { %196 = vadd.xlane.f32.xlu1 %v195_v25 }
 0x1e7   :  { %v194_v26 = vmul.f32 %v192_v24, %v192_v24 }
 0x1e9   :  { %v198_v27 = vsel %vm131_vm1, %v194_v26, 0.0 }
 0x1ea   :  { %199 = vadd.xlane.f32.xlu1 %v198_v27 }
 0x273   :  { %v197_v28 = vpop.xlane.xlu1 %196 }
 0x274   :  { %v201_v29 = vmul.f32 0.03125, %v197_v28 }
 0x276   :  { %v203_v30 = vadd.f32 1e-12, %v201_v29 }
 0x277   :  { %v200_v31 = vpop.xlane.xlu1 %199 }
 0x278   :  { %298 = vrsqrt.f32 %v203_v30  ;;  %v202_v32 = vmul.f32 0.03125, %v200_v31 }
 0x27a   :  { %v204_v33 = vadd.f32 1e-12, %v202_v32 }
 0x27c   :  { %300 = vrsqrt.f32 %v204_v33 }
 0x282   :  { %v299_v34 = vpop.eup %298 }
 0x283   :  { %v207_v36 = vmul.f32 %v299_v34, %v191_v20 }
 0x285   :  { %v216_v38 = vmul.f32 %v263_v35, %v207_v36 }
 0x286   :  { %v301_v39 = vpop.eup %300 }
 0x287   :  { %v208_v40 = vmul.f32 %v301_v39, %v192_v24  ;;  %v225_v41 = vadd.f32 %v264_v37, %v216_v38 }
 0x289   :  { %v217_v42 = vmul.f32 %v263_v35, %v208_v40  ;;  %v267_v43 = vpack.c.bf16 %v225_v41, %v225_v41 }
 0x28b   :  { %v226_v44 = vadd.f32 %v264_v37, %v217_v42  ;;  %236 = vst.msk [vmem:[#allocation13] sm:$0xf] %vm235_vm2, %v267_v43 }
 0x28d   :  { %v268_v45 = vpack.c.bf16 %v226_v44, %v226_v44 }
 0x28f   :  { %237 = vst.msk [vmem:[#allocation13 + $0x4] sm:$0xf] %vm235_vm2, %v268_v45 }
 0x290   :  { %445 = shalt.err (!%p442_p10)
}
 0x291   :  { %s446_s27 = scalar_lea.hbm %s626_s6, 128 }
 0x292   :  { %p447_p11 = scmp.ne.s32.totalorder %s626_s6, %s446_s27  ;;  %p450_p12 = scmp.lt.u32.totalorder %s446_s27, %s626_s6 }
 0x294   :  { %p452_p13 = pnand %p450_p12, %p447_p11 }
 0x296   :  { %455 = shalt.err (!%p452_p13)
}
 0x297   :  { %249 = dma.vmem_to_hbm [thread:$0]  %s244_s21, 128, %s626_s6, [#allocation4], %s468_s9, %s468_s9, %s469_s10  }
 0x298   :  { %464 = dma.done.wait [#allocation4], 128  }
 0x299   :  { %465 = vsyncadd [#allocation4], 4294967168 }
 0x29a   :  { %253 = vsyncpa [#allocation3], 1 }
 0x29b   :  { %254 = vsyncpa [#allocation6], 1 }
 0x29c   :  { %255 = vsyncpa [#allocation9], 1 }
 0x29d   :  { %256 = vsyncpa [#allocation12], 1 }
 0x29e   :  { %257 = vsyncpa [#allocation4], 1 }

// kernel: _lambda_.18
= control target key start
LH: loop header
LB: loop body
LE: loop exit
PB: predicated region body
PF: predicated region fallthrough
CT: control target
= control target key end

     0   :  { %8 = vsyncpa [#allocation3], 0  ;;  %s398_s0 = inlined_call_operand.hbm [shape: bf16[16,32], index: 0, kind: input, shape index: {}]   ;;  %s399_s1 = inlined_call_operand.hbm [shape: bf16[32,64], index: 1, kind: input, shape index: {}]   ;;  %s400_s2 = inlined_call_operand.hbm [shape: f32[1,64], index: 2, kind: input, shape index: {}]   ;;  %s401_s3 = inlined_call_operand.hbm [shape: bf16[16,64], index: 3, kind: output, shape index: {}]  }
   0x1   :  { %9 = vsyncpa [#allocation6], 0 }
   0x2   :  { %10 = vsyncpa [#allocation4], 0  ;;  %s306_s12 = smov [#allocation5]   ;;  %s307_s14 = smov [#allocation2]  }
   0x3   :  { %s28_s13 = sshll.u32 %s306_s12, 4  ;;  %s16_s15 = sshll.u32 %s307_s14, 4  ;;  %s29_s13 = int_to_ptr.vmem [resolvable:$true] %s28_s13  ;;  %s334_s15 = int_to_ptr.vmem [resolvable:$true] %s16_s15 }
   0x4   :  { %s212_s18 = scalar_lea.hbm %s399_s1, 256 }
   0x5   :  { %p213_p0 = scmp.ne.s32.totalorder %s399_s1, %s212_s18  ;;  %p216_p1 = scmp.lt.u32.totalorder %s212_s18, %s399_s1 }
   0x7   :  { %p218_p2 = pnand %p216_p1, %p213_p0 }
   0x9   :  { %221 = shalt.err (!%p218_p2)
}
   0xa   :  { %s222_s23 = scalar_lea.vmem %s29_s13, 256  ;;  %p227_p4 = scmp.lt.s32.totalorder %s29_s13, %s29_s13 }
   0xb   :  { %p223_p3 = scmp.ne.s32.totalorder %s29_s13, %s222_s23  ;;  %p228_p5 = scmp.lt.s32.totalorder %s222_s23, %s222_s23 }
   0xd   :  { %p229_p6 = por %p228_p5, %p227_p4 }
   0xf   :  { %p230_p7 = pnand %p229_p6, %p223_p3 }
  0x11   :  { %233 = shalt.err (!%p230_p7)
}
  0x12   :  { %s308_s24 = smov 64   ;;  %s309_s25 = smov 4  }
  0x13   :  { %34 = dma.hbm_to_vmem [thread:$0]  %s399_s1, 256, %s29_s13, [#allocation6], %s308_s24, %s308_s24, %s309_s25  }
  0x14   :  { %s234_s30 = scalar_lea.hbm %s398_s0, 128 }
  0x15   :  { %p235_p8 = scmp.ne.s32.totalorder %s398_s0, %s234_s30  ;;  %p238_p9 = scmp.lt.u32.totalorder %s234_s30, %s398_s0 }
  0x17   :  { %p240_p10 = pnand %p238_p9, %p235_p8 }
  0x19   :  { %243 = shalt.err (!%p240_p10)
}
  0x1a   :  { %s244_s8 = scalar_lea.vmem %s334_s15, 128  ;;  %p249_p12 = scmp.lt.s32.totalorder %s334_s15, %s334_s15 }
  0x1b   :  { %p245_p11 = scmp.ne.s32.totalorder %s334_s15, %s244_s8  ;;  %p250_p13 = scmp.lt.s32.totalorder %s244_s8, %s244_s8 }
  0x1d   :  { %p251_p0 = por %p250_p13, %p249_p12 }
  0x1f   :  { %p252_p1 = pnand %p251_p0, %p245_p11 }
  0x21   :  { %255 = shalt.err (!%p252_p1)
}
  0x22   :  { %22 = dma.hbm_to_vmem [thread:$0]  %s398_s0, 128, %s334_s15, [#allocation3], %s308_s24, %s308_s24, %s309_s25  }
  0x23   :  { %s310_s10 = smov [#allocation7]   ;;  %s256_s14 = scalar_lea.hbm %s400_s2, 16 }
  0x24   :  { %s41_s11 = sshll.u32 %s310_s10, 4  ;;  %p257_p2 = scmp.ne.s32.totalorder %s400_s2, %s256_s14  ;;  %s42_s11 = int_to_ptr.vmem [resolvable:$true] %s41_s11 }
  0x25   :  { %p260_p3 = scmp.lt.u32.totalorder %s256_s14, %s400_s2 }
  0x27   :  { %p262_p4 = pnand %p260_p3, %p257_p2 }
  0x29   :  { %265 = shalt.err (!%p262_p4)
}
  0x2a   :  { %s266_s20 = scalar_lea.vmem %s42_s11, 16  ;;  %s270_s0 = scalar_lea.vmem %s42_s11, 32 }
  0x2b   :  { %p267_p5 = scmp.ne.s32.totalorder %s42_s11, %s266_s20  ;;  %p271_p6 = scmp.lt.s32.totalorder %s42_s11, %s42_s11 }
  0x2c   :  { %p272_p7 = scmp.lt.s32.totalorder %s270_s0, %s266_s20 }
  0x2e   :  { %p273_p8 = por %p272_p7, %p271_p6 }
  0x30   :  { %p274_p9 = pnand %p273_p8, %p267_p5 }
  0x32   :  { %277 = shalt.err (!%p274_p9)
}
  0x33   :  { %44 = dma.hbm_to_vmem [thread:$0]  %s400_s2, 16, %s42_s11, [#allocation6]  }
  0x34   :  { %300 = dma.done.wait [#allocation3], 128  }
  0x35   :  { %301 = vsyncadd [#allocation3], 4294967168 }
  0x36   :  { %302 = dma.done.wait [#allocation6], 272  }
  0x37   :  { %303 = vsyncadd [#allocation6], 4294967024  ;;  %v311_v0 = vmov 0.0   ;;  %vm312_vm0 = vmmov 0   ;;  %v205_v1 = vld [vmem:[#allocation5] sm:$0xff]   ;;  %v206_v2 = vld [vmem:[#allocation5 + $0x8] sm:$0xff]  }
  0x38   :  { %189 = vmatprep.subr.bf16.mxu0 %v311_v0  ;;  %193 = vmatprep.mubr.msk.bf16.mxu0 %vm312_vm0, %v311_v0  ;;  %v207_v3 = vld [vmem:[#allocation2] sm:$0xff]   ;;  %vm85_vm1 = vcmask 261120   ;;  %v177_v4 = vld [vmem:[#allocation7] ss:$0 sm:$0xff]  ;;  %vm156_vm2 = vcmask 519168   ;;  %s313_s2 = smov [#allocation8]  }
  0x39   :  { %190 = vmatpush3.bf16.msra.mxu0 %v205_v1  ;;  %s164_s22 = sshll.u32 %s313_s2, 4  ;;  %s165_s22 = int_to_ptr.vmem [resolvable:$true] %s164_s22 }
  0x3a   :  { %191 = vmatprep.subr.bf16.mxu0 %v311_v0  ;;  %s278_s23 = scalar_lea.vmem %s165_s22, 128  ;;  %p283_p11 = scmp.lt.s32.totalorder %s165_s22, %s165_s22 }
  0x3b   :  { %p279_p10 = scmp.ne.s32.totalorder %s165_s22, %s278_s23  ;;  %p284_p12 = scmp.lt.s32.totalorder %s278_s23, %s278_s23 }
  0x3d   :  { %192 = vmatpush3.bf16.msra.mxu0 %v206_v2  ;;  %p285_p13 = por %p284_p12, %p283_p11 }
  0x3f   :  { %p286_p0 = pnand %p285_p13, %p279_p10 }
  0x40   :  { %194 = vmatmul.mubr.msk.bf16.vlgmr.msra.gmra.mrb[0].mxu0 %vm85_vm1, %v207_v3 }
 0x113   :  { %v123_v5 = vpop.f32.mrb[0].mxu0 }
 0x114   :  { %v124_v6 = vadd.f32 %v177_v4, %v123_v5  ;;  %v195_v7 = vpop.f32.mrb[1].mxu0 }
 0x115   :  { %v126_v8 = vpop.f32.mrb[2].mxu0 }
 0x116   :  { %v130_v9 = vmul.f32 %v124_v6, %v124_v6  ;;  %v127_v10 = vadd.f32 %v177_v4, %v126_v8  ;;  %v196_v11 = vpop.f32.mrb[3].mxu0 }
 0x118   :  { %v132_v12 = vmul.f32 %v130_v9, %v124_v6  ;;  %v131_v13 = vmul.f32 %v127_v10, %v127_v10 }
 0x11a   :  { %v134_v14 = vmul.f32 0.044715, %v132_v12  ;;  %v133_v15 = vmul.f32 %v131_v13, %v127_v10 }
 0x11c   :  { %v136_v16 = vadd.f32 %v134_v14, %v124_v6  ;;  %v135_v17 = vmul.f32 0.044715, %v133_v15 }
 0x11e   :  { %v138_v18 = vmul.f32 0.7978846, %v136_v16  ;;  %v137_v19 = vadd.f32 %v135_v17, %v127_v10 }
 0x120   :  { %208 = vtanh.f32 %v138_v18  ;;  %v139_v20 = vmul.f32 0.7978846, %v137_v19 }
 0x122   :  { %210 = vtanh.f32 %v139_v20 }
 0x12a   :  { %v209_v21 = vpop.eup %208 }
 0x12b   :  { %v142_v22 = vadd.f32 1.0, %v209_v21 }
 0x12c   :  { %v211_v23 = vpop.eup %210 }
 0x12d   :  { %v143_v24 = vadd.f32 1.0, %v211_v23  ;;  %v144_v25 = vmul.f32 0.5, %v142_v22 }
 0x12f   :  { %v145_v26 = vmul.f32 0.5, %v143_v24  ;;  %v146_v27 = vmul.f32 %v144_v25, %v124_v6 }
 0x131   :  { %v147_v28 = vmul.f32 %v145_v26, %v127_v10  ;;  %v184_v29 = vpack.c.bf16 %v146_v27, %v146_v27 }
 0x133   :  { %v185_v30 = vpack.c.bf16 %v147_v28, %v147_v28  ;;  %157 = vst.msk [vmem:[#allocation8] sm:$0xf] %vm156_vm2, %v184_v29 }
 0x135   :  { %158 = vst.msk [vmem:[#allocation8 + $0x4] sm:$0xf] %vm156_vm2, %v185_v30 }
 0x136   :  { %289 = shalt.err (!%p286_p0)
}
 0x137   :  { %s290_s28 = scalar_lea.hbm %s401_s3, 128 }
 0x138   :  { %p291_p1 = scmp.ne.s32.totalorder %s401_s3, %s290_s28  ;;  %p294_p2 = scmp.lt.u32.totalorder %s290_s28, %s401_s3 }
 0x13a   :  { %p296_p3 = pnand %p294_p2, %p291_p1 }
 0x13c   :  { %299 = shalt.err (!%p296_p3)
}
 0x13d   :  { %170 = dma.vmem_to_hbm [thread:$0]  %s165_s22, 128, %s401_s3, [#allocation4], %s308_s24, %s308_s24, %s309_s25  }
 0x13e   :  { %304 = dma.done.wait [#allocation4], 128  }
 0x13f   :  { %305 = vsyncadd [#allocation4], 4294967168 }
 0x140   :  { %174 = vsyncpa [#allocation3], 1 }
 0x141   :  { %175 = vsyncpa [#allocation6], 1 }
 0x142   :  { %176 = vsyncpa [#allocation4], 1 }

// kernel: _lambda_.26
= control target key start
LH: loop header
LB: loop body
LE: loop exit
PB: predicated region body
PF: predicated region fallthrough
CT: control target
= control target key end

     0   :  { %8 = vsyncpa [#allocation3], 0  ;;  %s333_s0 = inlined_call_operand.hbm [shape: bf16[2,32], index: 0, kind: input, shape index: {}]   ;;  %s334_s1 = inlined_call_operand.hbm [shape: bf16[32,128], index: 1, kind: input, shape index: {}]   ;;  %s335_s2 = inlined_call_operand.hbm [shape: f32[1,128], index: 2, kind: input, shape index: {}]   ;;  %s336_s3 = inlined_call_operand.hbm [shape: f32[2,128], index: 3, kind: output, shape index: {}]  }
   0x1   :  { %9 = vsyncpa [#allocation6], 0 }
   0x2   :  { %10 = vsyncpa [#allocation4], 0  ;;  %s257_s12 = smov [#allocation5]   ;;  %s163_s16 = scalar_lea.hbm %s334_s1, 256 }
   0x3   :  { %s26_s13 = sshll.u32 %s257_s12, 4  ;;  %p164_p0 = scmp.ne.s32.totalorder %s334_s1, %s163_s16  ;;  %s27_s13 = int_to_ptr.vmem [resolvable:$true] %s26_s13 }
   0x4   :  { %p167_p1 = scmp.lt.u32.totalorder %s163_s16, %s334_s1 }
   0x6   :  { %p169_p2 = pnand %p167_p1, %p164_p0 }
   0x8   :  { %172 = shalt.err (!%p169_p2)
}
   0x9   :  { %s173_s21 = scalar_lea.vmem %s27_s13, 256  ;;  %p178_p4 = scmp.lt.s32.totalorder %s27_s13, %s27_s13 }
   0xa   :  { %p174_p3 = scmp.ne.s32.totalorder %s27_s13, %s173_s21  ;;  %p179_p5 = scmp.lt.s32.totalorder %s173_s21, %s173_s21 }
   0xc   :  { %p180_p6 = por %p179_p5, %p178_p4 }
   0xe   :  { %p181_p7 = pnand %p180_p6, %p174_p3 }
  0x10   :  { %184 = shalt.err (!%p181_p7)
}
  0x11   :  { %s258_s22 = smov 64   ;;  %s259_s23 = smov 4  }
  0x12   :  { %32 = dma.hbm_to_vmem [thread:$0]  %s334_s1, 256, %s27_s13, [#allocation6], %s258_s22, %s258_s22, %s259_s23  }
  0x13   :  { %s260_s26 = smov [#allocation2]   ;;  %s261_s28 = smov [#allocation7]  }
  0x14   :  { %s17_s27 = sshll.u32 %s260_s26, 4  ;;  %s39_s29 = sshll.u32 %s261_s28, 4  ;;  %s18_s27 = int_to_ptr.vmem [resolvable:$true] %s17_s27  ;;  %s40_s29 = int_to_ptr.vmem [resolvable:$true] %s39_s29 }
  0x15   :  { %s185_s5 = scalar_lea.hbm %s333_s0, 16 }
  0x16   :  { %p186_p8 = scmp.ne.s32.totalorder %s333_s0, %s185_s5  ;;  %p189_p9 = scmp.lt.u32.totalorder %s185_s5, %s333_s0 }
  0x18   :  { %p191_p10 = pnand %p189_p9, %p186_p8 }
  0x1a   :  { %194 = shalt.err (!%p191_p10)
}
  0x1b   :  { %s195_s1 = scalar_lea.vmem %s18_s27, 16  ;;  %s199_s10 = scalar_lea.vmem %s18_s27, 32 }
  0x1c   :  { %p196_p11 = scmp.ne.s32.totalorder %s18_s27, %s195_s1  ;;  %p200_p12 = scmp.lt.s32.totalorder %s18_s27, %s18_s27 }
  0x1d   :  { %p201_p13 = scmp.lt.s32.totalorder %s199_s10, %s195_s1 }
  0x1f   :  { %p202_p0 = por %p201_p13, %p200_p12 }
  0x21   :  { %p203_p1 = pnand %p202_p0, %p196_p11 }
  0x23   :  { %206 = shalt.err (!%p203_p1)
}
  0x24   :  { %20 = dma.hbm_to_vmem [thread:$0]  %s333_s0, 16, %s18_s27, [#allocation3]  }
  0x25   :  { %s207_s15 = scalar_lea.hbm %s335_s2, 16 }
  0x26   :  { %p208_p2 = scmp.ne.s32.totalorder %s335_s2, %s207_s15  ;;  %p211_p3 = scmp.lt.u32.totalorder %s207_s15, %s335_s2 }
  0x28   :  { %p213_p4 = pnand %p211_p3, %p208_p2 }
  0x2a   :  { %216 = shalt.err (!%p213_p4)
}
  0x2b   :  { %s217_s20 = scalar_lea.vmem %s40_s29, 16  ;;  %s221_s21 = scalar_lea.vmem %s40_s29, 32 }
  0x2c   :  { %p218_p5 = scmp.ne.s32.totalorder %s40_s29, %s217_s20  ;;  %p222_p6 = scmp.lt.s32.totalorder %s40_s29, %s40_s29 }
  0x2d   :  { %p223_p7 = scmp.lt.s32.totalorder %s221_s21, %s217_s20 }
  0x2f   :  { %p224_p8 = por %p223_p7, %p222_p6 }
  0x31   :  { %p225_p9 = pnand %p224_p8, %p218_p5 }
  0x33   :  { %228 = shalt.err (!%p225_p9)
}
  0x34   :  { %42 = dma.hbm_to_vmem [thread:$0]  %s335_s2, 16, %s40_s29, [#allocation6]  }
  0x35   :  { %251 = dma.done.wait [#allocation3], 16  }
  0x36   :  { %252 = vsyncadd [#allocation3], 4294967280 }
  0x37   :  { %253 = dma.done.wait [#allocation6], 272  }
  0x38   :  { %254 = vsyncadd [#allocation6], 4294967024  ;;  %v262_v0 = vmov 0.0   ;;  %vm263_vm0 = vmmov 0   ;;  %v161_v1 = vld [vmem:[#allocation5] sm:$0xff]   ;;  %v162_v2 = vld [vmem:[#allocation5 + $0x8] sm:$0xff]  }
  0x39   :  { %145 = vmatprep.subr.bf16.mxu0 %v262_v0  ;;  %149 = vmatprep.mubr.msk.bf16.mxu0 %vm263_vm0, %v262_v0  ;;  %v53_v3 = vld [vmem:[#allocation2] sm:$0x1]  ;;  %vm77_vm1 = vcmask 261120   ;;  %v138_v4 = vld [vmem:[#allocation7] ss:$0 sm:$0xff]  ;;  %s264_s23 = smov [#allocation8]  }
  0x3a   :  { %146 = vmatpush3.bf16.msra.mxu0 %v161_v1  ;;  %s128_s24 = sshll.u32 %s264_s23, 4  ;;  %s129_s24 = int_to_ptr.vmem [resolvable:$true] %s128_s24 }
  0x3b   :  { %147 = vmatprep.subr.bf16.mxu0 %v262_v0  ;;  %s229_s2 = scalar_lea.vmem %s129_s24, 32  ;;  %p234_p11 = scmp.lt.s32.totalorder %s129_s24, %s129_s24 }
  0x3c   :  { %p230_p10 = scmp.ne.s32.totalorder %s129_s24, %s229_s2  ;;  %p235_p12 = scmp.lt.s32.totalorder %s229_s2, %s229_s2 }
  0x3e   :  { %148 = vmatpush3.bf16.msra.mxu0 %v162_v2  ;;  %p236_p13 = por %p235_p12, %p234_p11 }
  0x40   :  { %p237_p0 = pnand %p236_p13, %p230_p10 }
  0x41   :  { %150 = vmatmul.mubr.msk.bf16.vlgmr.msra.gmra.mrb[0].mxu0 %vm77_vm1, %v53_v3 }
 0x114   :  { %v115_v5 = vpop.f32.mrb[0].mxu0 }
 0x115   :  { %v116_v6 = vadd.f32 %v138_v4, %v115_v5  ;;  %v151_v7 = vpop.f32.mrb[1].mxu0 }
 0x116   :  { %v118_v8 = vpop.f32.mrb[2].mxu0 }
 0x117   :  { %121 = vst [vmem:[#allocation8] sm:$0x3] %v116_v6  ;;  %v152_v9 = vpop.f32.mrb[3].mxu0 }
 0x118   :  { %240 = shalt.err (!%p237_p0)
}
 0x119   :  { %s241_s27 = scalar_lea.hbm %s336_s3, 32 }
 0x11a   :  { %p242_p1 = scmp.ne.s32.totalorder %s336_s3, %s241_s27  ;;  %p245_p2 = scmp.lt.u32.totalorder %s241_s27, %s336_s3 }
 0x11c   :  { %p247_p3 = pnand %p245_p2, %p242_p1 }
 0x11e   :  { %250 = shalt.err (!%p247_p3)
}
 0x11f   :  { %131 = dma.vmem_to_hbm [thread:$0]  %s129_s24, 32, %s336_s3, [#allocation4]  }
 0x120   :  { %255 = dma.done.wait [#allocation4], 32  }
 0x121   :  { %256 = vsyncadd [#allocation4], 4294967264 }
 0x122   :  { %135 = vsyncpa [#allocation3], 1 }
 0x123   :  { %136 = vsyncpa [#allocation6], 1 }
 0x124   :  { %137 = vsyncpa [#allocation4], 1 }

// kernel: _lambda_.25
= control target key start
LH: loop header
LB: loop body
LE: loop exit
PB: predicated region body
PF: predicated region fallthrough
CT: control target
= control target key end

     0   :  { %8 = vsyncpa [#allocation3], 0  ;;  %s338_s0 = inlined_call_operand.hbm [shape: bf16[2,32], index: 0, kind: input, shape index: {}]   ;;  %s339_s1 = inlined_call_operand.hbm [shape: bf16[32,32], index: 1, kind: input, shape index: {}]   ;;  %s340_s2 = inlined_call_operand.hbm [shape: f32[1,32], index: 2, kind: input, shape index: {}]   ;;  %s341_s3 = inlined_call_operand.hbm [shape: bf16[2,32], index: 3, kind: output, shape index: {}]  }
   0x1   :  { %9 = vsyncpa [#allocation6], 0 }
   0x2   :  { %10 = vsyncpa [#allocation4], 0  ;;  %s262_s12 = smov [#allocation5]   ;;  %s168_s16 = scalar_lea.hbm %s339_s1, 256 }
   0x3   :  { %s26_s13 = sshll.u32 %s262_s12, 4  ;;  %p169_p0 = scmp.ne.s32.totalorder %s339_s1, %s168_s16  ;;  %s27_s13 = int_to_ptr.vmem [resolvable:$true] %s26_s13 }
   0x4   :  { %p172_p1 = scmp.lt.u32.totalorder %s168_s16, %s339_s1 }
   0x6   :  { %p174_p2 = pnand %p172_p1, %p169_p0 }
   0x8   :  { %177 = shalt.err (!%p174_p2)
}
   0x9   :  { %s178_s21 = scalar_lea.vmem %s27_s13, 256  ;;  %p183_p4 = scmp.lt.s32.totalorder %s27_s13, %s27_s13 }
   0xa   :  { %p179_p3 = scmp.ne.s32.totalorder %s27_s13, %s178_s21  ;;  %p184_p5 = scmp.lt.s32.totalorder %s178_s21, %s178_s21 }
   0xc   :  { %p185_p6 = por %p184_p5, %p183_p4 }
   0xe   :  { %p186_p7 = pnand %p185_p6, %p179_p3 }
  0x10   :  { %189 = shalt.err (!%p186_p7)
}
  0x11   :  { %s263_s22 = smov 64   ;;  %s264_s23 = smov 4  }
  0x12   :  { %32 = dma.hbm_to_vmem [thread:$0]  %s339_s1, 256, %s27_s13, [#allocation6], %s263_s22, %s263_s22, %s264_s23  }
  0x13   :  { %s265_s26 = smov [#allocation2]   ;;  %s266_s28 = smov [#allocation7]  }
  0x14   :  { %s17_s27 = sshll.u32 %s265_s26, 4  ;;  %s39_s29 = sshll.u32 %s266_s28, 4  ;;  %s18_s27 = int_to_ptr.vmem [resolvable:$true] %s17_s27  ;;  %s40_s29 = int_to_ptr.vmem [resolvable:$true] %s39_s29 }
  0x15   :  { %s190_s5 = scalar_lea.hbm %s338_s0, 16 }
  0x16   :  { %p191_p8 = scmp.ne.s32.totalorder %s338_s0, %s190_s5  ;;  %p194_p9 = scmp.lt.u32.totalorder %s190_s5, %s338_s0 }
  0x18   :  { %p196_p10 = pnand %p194_p9, %p191_p8 }
  0x1a   :  { %199 = shalt.err (!%p196_p10)
}
  0x1b   :  { %s200_s1 = scalar_lea.vmem %s18_s27, 16  ;;  %s204_s10 = scalar_lea.vmem %s18_s27, 32 }
  0x1c   :  { %p201_p11 = scmp.ne.s32.totalorder %s18_s27, %s200_s1  ;;  %p205_p12 = scmp.lt.s32.totalorder %s18_s27, %s18_s27 }
  0x1d   :  { %p206_p13 = scmp.lt.s32.totalorder %s204_s10, %s200_s1 }
  0x1f   :  { %p207_p0 = por %p206_p13, %p205_p12 }
  0x21   :  { %p208_p1 = pnand %p207_p0, %p201_p11 }
  0x23   :  { %211 = shalt.err (!%p208_p1)
}
  0x24   :  { %20 = dma.hbm_to_vmem [thread:$0]  %s338_s0, 16, %s18_s27, [#allocation3]  }
  0x25   :  { %s212_s15 = scalar_lea.hbm %s340_s2, 16 }
  0x26   :  { %p213_p2 = scmp.ne.s32.totalorder %s340_s2, %s212_s15  ;;  %p216_p3 = scmp.lt.u32.totalorder %s212_s15, %s340_s2 }
  0x28   :  { %p218_p4 = pnand %p216_p3, %p213_p2 }
  0x2a   :  { %221 = shalt.err (!%p218_p4)
}
  0x2b   :  { %s222_s20 = scalar_lea.vmem %s40_s29, 16  ;;  %s226_s21 = scalar_lea.vmem %s40_s29, 32 }
  0x2c   :  { %p223_p5 = scmp.ne.s32.totalorder %s40_s29, %s222_s20  ;;  %p227_p6 = scmp.lt.s32.totalorder %s40_s29, %s40_s29 }
  0x2d   :  { %p228_p7 = scmp.lt.s32.totalorder %s226_s21, %s222_s20 }
  0x2f   :  { %p229_p8 = por %p228_p7, %p227_p6 }
  0x31   :  { %p230_p9 = pnand %p229_p8, %p223_p5 }
  0x33   :  { %233 = shalt.err (!%p230_p9)
}
  0x34   :  { %42 = dma.hbm_to_vmem [thread:$0]  %s340_s2, 16, %s40_s29, [#allocation6]  }
  0x35   :  { %256 = dma.done.wait [#allocation3], 16  }
  0x36   :  { %257 = vsyncadd [#allocation3], 4294967280 }
  0x37   :  { %258 = dma.done.wait [#allocation6], 272  }
  0x38   :  { %259 = vsyncadd [#allocation6], 4294967024  ;;  %v267_v0 = vmov 0.0   ;;  %vm268_vm0 = vmmov 0   ;;  %v164_v1 = vld [vmem:[#allocation5] sm:$0xff]   ;;  %v165_v2 = vld [vmem:[#allocation5 + $0x8] sm:$0xff]  }
  0x39   :  { %148 = vmatprep.subr.bf16.mxu0 %v267_v0  ;;  %152 = vmatprep.mubr.msk.bf16.mxu0 %vm268_vm0, %v267_v0  ;;  %v53_v3 = vld [vmem:[#allocation2] sm:$0x1]  ;;  %vm77_vm1 = vcmask 261120   ;;  %v141_v4 = vld [vmem:[#allocation7] ss:$0 sm:$0xff]  ;;  %s269_s2 = smov [#allocation8]  }
  0x3a   :  { %149 = vmatpush3.bf16.msra.mxu0 %v164_v1  ;;  %s131_s23 = sshll.u32 %s269_s2, 4  ;;  %vm123_vm2 = vcmask 253952   ;;  %s132_s23 = int_to_ptr.vmem [resolvable:$true] %s131_s23 }
  0x3b   :  { %150 = vmatprep.subr.bf16.mxu0 %v267_v0  ;;  %s234_s24 = scalar_lea.vmem %s132_s23, 16  ;;  %s238_s25 = scalar_lea.vmem %s132_s23, 32 }
  0x3c   :  { %p235_p10 = scmp.ne.s32.totalorder %s132_s23, %s234_s24  ;;  %p239_p11 = scmp.lt.s32.totalorder %s132_s23, %s132_s23 }
  0x3d   :  { %p240_p12 = scmp.lt.s32.totalorder %s238_s25, %s234_s24 }
  0x3e   :  { %151 = vmatpush3.bf16.msra.mxu0 %v165_v2 }
  0x3f   :  { %p241_p13 = por %p240_p12, %p239_p11 }
  0x41   :  { %153 = vmatmul.mubr.msk.bf16.vlgmr.msra.gmra.mrb[0].mxu0 %vm77_vm1, %v53_v3  ;;  %p242_p0 = pnand %p241_p13, %p235_p10 }
 0x114   :  { %v115_v5 = vpop.f32.mrb[0].mxu0 }
 0x115   :  { %v116_v6 = vadd.f32 %v141_v4, %v115_v5  ;;  %v154_v7 = vpop.f32.mrb[1].mxu0 }
 0x116   :  { %v118_v8 = vpop.f32.mrb[2].mxu0 }
 0x117   :  { %166 = vtanh.f32 %v116_v6  ;;  %v155_v9 = vpop.f32.mrb[3].mxu0 }
 0x121   :  { %v167_v10 = vpop.eup %166 }
 0x122   :  { %v122_v11 = vpack.c.bf16 %v167_v10, %v167_v10 }
 0x124   :  { %124 = vst.msk [vmem:[#allocation8] sm:$0x1] %vm123_vm2, %v122_v11 }
 0x125   :  { %245 = shalt.err (!%p242_p0)
}
 0x126   :  { %s246_s28 = scalar_lea.hbm %s341_s3, 16 }
 0x127   :  { %p247_p1 = scmp.ne.s32.totalorder %s341_s3, %s246_s28  ;;  %p250_p2 = scmp.lt.u32.totalorder %s246_s28, %s341_s3 }
 0x129   :  { %p252_p3 = pnand %p250_p2, %p247_p1 }
 0x12b   :  { %255 = shalt.err (!%p252_p3)
}
 0x12c   :  { %134 = dma.vmem_to_hbm [thread:$0]  %s132_s23, 16, %s341_s3, [#allocation4]  }
 0x12d   :  { %260 = dma.done.wait [#allocation4], 16  }
 0x12e   :  { %261 = vsyncadd [#allocation4], 4294967280 }
 0x12f   :  { %138 = vsyncpa [#allocation3], 1 }
 0x130   :  { %139 = vsyncpa [#allocation6], 1 }
 0x131   :  { %140 = vsyncpa [#allocation4], 1 }

// kernel: _lambda_.19
= control target key start
LH: loop header
LB: loop body
LE: loop exit
PB: predicated region body
PF: predicated region fallthrough
CT: control target
= control target key end

     0   :  { %11 = vsyncpa [#allocation3], 0  ;;  %s646_s0 = inlined_call_operand.hbm [shape: bf16[16,64], index: 0, kind: input, shape index: {}]   ;;  %s647_s1 = inlined_call_operand.hbm [shape: bf16[64,32], index: 1, kind: input, shape index: {}]   ;;  %s648_s2 = inlined_call_operand.hbm [shape: f32[1,32], index: 2, kind: input, shape index: {}]   ;;  %s649_s3 = inlined_call_operand.hbm [shape: bf16[16,32], index: 3, kind: input, shape index: {}]   ;;  %s650_s4 = inlined_call_operand.hbm [shape: f32[1,32], index: 4, kind: input, shape index: {}]   ;;  %s651_s5 = inlined_call_operand.hbm [shape: f32[1,32], index: 5, kind: input, shape index: {}]   ;;  %s652_s6 = inlined_call_operand.hbm [shape: bf16[16,32], index: 6, kind: output, shape index: {}]  }
   0x1   :  { %12 = vsyncpa [#allocation6], 0 }
   0x2   :  { %13 = vsyncpa [#allocation9], 0 }
   0x3   :  { %14 = vsyncpa [#allocation12], 0 }
   0x4   :  { %15 = vsyncpa [#allocation4], 0  ;;  %s493_s21 = smov [#allocation5]   ;;  %s494_s23 = smov [#allocation8]  }
   0x5   :  { %s33_s22 = sshll.u32 %s493_s21, 4  ;;  %s55_s24 = sshll.u32 %s494_s23, 4  ;;  %s34_s22 = int_to_ptr.vmem [resolvable:$true] %s33_s22  ;;  %s539_s24 = int_to_ptr.vmem [resolvable:$true] %s55_s24 }
   0x6   :  { %s329_s27 = scalar_lea.hbm %s647_s1, 512 }
   0x7   :  { %p330_p0 = scmp.ne.s32.totalorder %s647_s1, %s329_s27  ;;  %p333_p1 = scmp.lt.u32.totalorder %s329_s27, %s647_s1 }
   0x9   :  { %p335_p2 = pnand %p333_p1, %p330_p0 }
   0xb   :  { %338 = shalt.err (!%p335_p2)
}
   0xc   :  { %s339_s8 = scalar_lea.vmem %s34_s22, 512  ;;  %p344_p4 = scmp.lt.s32.totalorder %s34_s22, %s34_s22 }
   0xd   :  { %p340_p3 = scmp.ne.s32.totalorder %s34_s22, %s339_s8  ;;  %p345_p5 = scmp.lt.s32.totalorder %s339_s8, %s339_s8 }
   0xf   :  { %p346_p6 = por %p345_p5, %p344_p4 }
  0x11   :  { %p347_p7 = pnand %p346_p6, %p340_p3 }
  0x13   :  { %350 = shalt.err (!%p347_p7)
}
  0x14   :  { %s495_s9 = smov 64   ;;  %s496_s10 = smov 4  }
  0x15   :  { %39 = dma.hbm_to_vmem [thread:$0]  %s647_s1, 512, %s34_s22, [#allocation6], %s495_s9, %s495_s9, %s496_s10  }
  0x16   :  { %s351_s15 = scalar_lea.hbm %s649_s3, 128 }
  0x17   :  { %p352_p8 = scmp.ne.s32.totalorder %s649_s3, %s351_s15  ;;  %p355_p9 = scmp.lt.u32.totalorder %s351_s15, %s649_s3 }
  0x19   :  { %p357_p10 = pnand %p355_p9, %p352_p8 }
  0x1b   :  { %360 = shalt.err (!%p357_p10)
}
  0x1c   :  { %s361_s20 = scalar_lea.vmem %s539_s24, 128  ;;  %p366_p12 = scmp.lt.s32.totalorder %s539_s24, %s539_s24 }
  0x1d   :  { %p362_p11 = scmp.ne.s32.totalorder %s539_s24, %s361_s20  ;;  %p367_p13 = scmp.lt.s32.totalorder %s361_s20, %s361_s20 }
  0x1f   :  { %p368_p0 = por %p367_p13, %p366_p12 }
  0x21   :  { %p369_p1 = pnand %p368_p0, %p362_p11 }
  0x23   :  { %372 = shalt.err (!%p369_p1)
}
  0x24   :  { %61 = dma.hbm_to_vmem [thread:$0]  %s649_s3, 128, %s539_s24, [#allocation9], %s495_s9, %s495_s9, %s496_s10  }
  0x25   :  { %s497_s22 = smov [#allocation2]   ;;  %s498_s25 = smov [#allocation7]  }
  0x26   :  { %s21_s23 = sshll.u32 %s497_s22, 4  ;;  %s46_s26 = sshll.u32 %s498_s25, 4  ;;  %s22_s23 = int_to_ptr.vmem [resolvable:$true] %s21_s23  ;;  %s47_s26 = int_to_ptr.vmem [resolvable:$true] %s46_s26 }
  0x27   :  { %s373_s29 = scalar_lea.hbm %s646_s0, 128 }
  0x28   :  { %p374_p2 = scmp.ne.s32.totalorder %s646_s0, %s373_s29  ;;  %p377_p3 = scmp.lt.u32.totalorder %s373_s29, %s646_s0 }
  0x2a   :  { %p379_p4 = pnand %p377_p3, %p374_p2 }
  0x2c   :  { %382 = shalt.err (!%p379_p4)
}
  0x2d   :  { %s383_s3 = scalar_lea.vmem %s22_s23, 128  ;;  %p388_p6 = scmp.lt.s32.totalorder %s22_s23, %s22_s23 }
  0x2e   :  { %p384_p5 = scmp.ne.s32.totalorder %s22_s23, %s383_s3  ;;  %p389_p7 = scmp.lt.s32.totalorder %s383_s3, %s383_s3 }
  0x30   :  { %p390_p8 = por %p389_p7, %p388_p6 }
  0x32   :  { %p391_p9 = pnand %p390_p8, %p384_p5 }
  0x34   :  { %394 = shalt.err (!%p391_p9)
}
  0x35   :  { %27 = dma.hbm_to_vmem [thread:$0]  %s646_s0, 128, %s22_s23, [#allocation3], %s495_s9, %s495_s9, %s496_s10  }
  0x36   :  { %s395_s15 = scalar_lea.hbm %s648_s2, 16 }
  0x37   :  { %p396_p10 = scmp.ne.s32.totalorder %s648_s2, %s395_s15  ;;  %p399_p11 = scmp.lt.u32.totalorder %s395_s15, %s648_s2 }
  0x39   :  { %p401_p12 = pnand %p399_p11, %p396_p10 }
  0x3b   :  { %404 = shalt.err (!%p401_p12)
}
  0x3c   :  { %s405_s20 = scalar_lea.vmem %s47_s26, 16  ;;  %s409_s1 = scalar_lea.vmem %s47_s26, 32 }
  0x3d   :  { %p406_p13 = scmp.ne.s32.totalorder %s47_s26, %s405_s20  ;;  %p410_p0 = scmp.lt.s32.totalorder %s47_s26, %s47_s26 }
  0x3e   :  { %p411_p1 = scmp.lt.s32.totalorder %s409_s1, %s405_s20 }
  0x40   :  { %p412_p2 = por %p411_p1, %p410_p0 }
  0x42   :  { %p413_p3 = pnand %p412_p2, %p406_p13 }
  0x44   :  { %416 = shalt.err (!%p413_p3)
}
  0x45   :  { %49 = dma.hbm_to_vmem [thread:$0]  %s648_s2, 16, %s47_s26, [#allocation6]  }
  0x46   :  { %s499_s22 = smov [#allocation10]   ;;  %s500_s25 = smov [#allocation11]  }
  0x47   :  { %s68_s23 = sshll.u32 %s499_s22, 4  ;;  %s78_s27 = sshll.u32 %s500_s25, 4  ;;  %s69_s23 = int_to_ptr.vmem [resolvable:$true] %s68_s23  ;;  %s79_s27 = int_to_ptr.vmem [resolvable:$true] %s78_s27 }
  0x48   :  { %s417_s30 = scalar_lea.hbm %s650_s4, 16 }
  0x49   :  { %p418_p4 = scmp.ne.s32.totalorder %s650_s4, %s417_s30  ;;  %p421_p5 = scmp.lt.u32.totalorder %s417_s30, %s650_s4 }
  0x4b   :  { %p423_p6 = pnand %p421_p5, %p418_p4 }
  0x4d   :  { %426 = shalt.err (!%p423_p6)
}
  0x4e   :  { %s427_s2 = scalar_lea.vmem %s69_s23, 16  ;;  %s431_s26 = scalar_lea.vmem %s69_s23, 32 }
  0x4f   :  { %p428_p7 = scmp.ne.s32.totalorder %s69_s23, %s427_s2  ;;  %p432_p8 = scmp.lt.s32.totalorder %s69_s23, %s69_s23 }
  0x50   :  { %p433_p9 = scmp.lt.s32.totalorder %s431_s26, %s427_s2 }
  0x52   :  { %p434_p10 = por %p433_p9, %p432_p8 }
  0x54   :  { %p435_p11 = pnand %p434_p10, %p428_p7 }
  0x56   :  { %438 = shalt.err (!%p435_p11)
}
  0x57   :  { %71 = dma.hbm_to_vmem [thread:$0]  %s650_s4, 16, %s69_s23, [#allocation9]  }
  0x58   :  { %s439_s15 = scalar_lea.hbm %s651_s5, 16 }
  0x59   :  { %p440_p12 = scmp.ne.s32.totalorder %s651_s5, %s439_s15  ;;  %p443_p13 = scmp.lt.u32.totalorder %s439_s15, %s651_s5 }
  0x5b   :  { %p445_p0 = pnand %p443_p13, %p440_p12 }
  0x5d   :  { %448 = shalt.err (!%p445_p0)
}
  0x5e   :  { %s449_s20 = scalar_lea.vmem %s79_s27, 16  ;;  %s453_s1 = scalar_lea.vmem %s79_s27, 32 }
  0x5f   :  { %p450_p1 = scmp.ne.s32.totalorder %s79_s27, %s449_s20  ;;  %p454_p2 = scmp.lt.s32.totalorder %s79_s27, %s79_s27 }
  0x60   :  { %p455_p3 = scmp.lt.s32.totalorder %s453_s1, %s449_s20 }
  0x62   :  { %p456_p4 = por %p455_p3, %p454_p2 }
  0x64   :  { %p457_p5 = pnand %p456_p4, %p450_p1 }
  0x66   :  { %460 = shalt.err (!%p457_p5)
}
  0x67   :  { %81 = dma.hbm_to_vmem [thread:$0]  %s651_s5, 16, %s79_s27, [#allocation12]  }
  0x68   :  { %483 = dma.done.wait [#allocation3], 128  }
  0x69   :  { %484 = vsyncadd [#allocation3], 4294967168 }
  0x6a   :  { %485 = dma.done.wait [#allocation6], 528  }
  0x6b   :  { %486 = vsyncadd [#allocation6], 4294966768 }
  0x6c   :  { %487 = dma.done.wait [#allocation9], 144  }
  0x6d   :  { %488 = vsyncadd [#allocation9], 4294967152 }
  0x6e   :  { %489 = dma.done.wait [#allocation12], 16  }
  0x6f   :  { %490 = vsyncadd [#allocation12], 4294967280  ;;  %v501_v0 = vmov 0.0   ;;  %vm502_vm0 = vmmov 0   ;;  %v320_v1 = vld [vmem:[#allocation5] sm:$0xff]   ;;  %v321_v2 = vld [vmem:[#allocation5 + $0x8] sm:$0xff]  }
  0x70   :  { %297 = vmatprep.subr.bf16.mxu0 %v501_v0  ;;  %305 = vmatprep.mubr.msk.bf16.mxu0 %vm502_vm0, %v501_v0  ;;  %v322_v3 = vld [vmem:[#allocation5 + $0x10] sm:$0xff]   ;;  %v323_v4 = vld [vmem:[#allocation5 + $0x18] sm:$0xff]   ;;  %vm147_vm1 = vcmask 523264   ;;  %v289_v6 = vld [vmem:[#allocation8] sm:$0xff]   ;;  %vm198_vm2 = vcmask 261120   ;;  %vm252_vm3 = vcmask 257024  }
  0x71   :  { %298 = vmatpush3.bf16.msra.mxu0 %v320_v1  ;;  %v324_v5 = vld [vmem:[#allocation2] sm:$0xff]   ;;  %v275_v7 = vld [vmem:[#allocation7] ss:$0 sm:$0xff]  ;;  %v290_v8 = vunpack.c.l.bf16 %v289_v6  ;;  %v291_v12 = vunpack.c.h.bf16 %v289_v6  ;;  %v282_v37 = vld [vmem:[#allocation10] ss:$0 sm:$0xff]  ;;  %s503_s5 = smov [#allocation13]  }
  0x72   :  { %299 = vmatprep.subr.bf16.mxu0 %v501_v0  ;;  %v283_v39 = vld [vmem:[#allocation11] ss:$0 sm:$0xff]  ;;  %s260_s21 = sshll.u32 %s503_s5, 4  ;;  %s261_s21 = int_to_ptr.vmem [resolvable:$true] %s260_s21 }
  0x73   :  { %s461_s22 = scalar_lea.vmem %s261_s21, 128  ;;  %p466_p7 = scmp.lt.s32.totalorder %s261_s21, %s261_s21 }
  0x74   :  { %p462_p6 = scmp.ne.s32.totalorder %s261_s21, %s461_s22  ;;  %p467_p8 = scmp.lt.s32.totalorder %s461_s22, %s461_s22 }
  0x75   :  { %300 = vmatpush3.bf16.msra.mxu0 %v321_v2 }
  0x76   :  { %301 = vmatprep.subr.bf16.mxu0 %v501_v0  ;;  %p468_p9 = por %p467_p8, %p466_p7 }
  0x78   :  { %p469_p10 = pnand %p468_p9, %p462_p6 }
  0x79   :  { %302 = vmatpush3.bf16.msra.mxu0 %v322_v3 }
  0x7a   :  { %303 = vmatprep.subr.bf16.mxu0 %v501_v0 }
  0x7d   :  { %304 = vmatpush3.bf16.msra.mxu0 %v323_v4 }
  0x80   :  { %306 = vmatmul.mubr.msk.bf16.vlgmr.msra.gmra.mrb[0].mxu0 %vm147_vm1, %v324_v5 }
 0x153   :  { %v185_v9 = vpop.f32.mrb[0].mxu0 }
 0x154   :  { %v186_v10 = vadd.f32 %v275_v7, %v185_v9  ;;  %v307_v11 = vpop.f32.mrb[1].mxu0 }
 0x155   :  { %v188_v13 = vpop.f32.mrb[2].mxu0 }
 0x156   :  { %v189_v14 = vadd.f32 %v275_v7, %v188_v13  ;;  %v308_v15 = vpop.f32.mrb[3].mxu0  ;;  %v196_v16 = vadd.f32 %v290_v8, %v186_v10 }
 0x158   :  { %v199_v17 = vsel %vm198_vm2, %v196_v16, 0.0  ;;  %v197_v18 = vadd.f32 %v291_v12, %v189_v14 }
 0x159   :  { %200 = vadd.xlane.f32.xlu0 %v199_v17 }
 0x15a   :  { %v202_v19 = vsel %vm198_vm2, %v197_v18, 0.0 }
 0x15d   :  { %203 = vadd.xlane.f32.xlu0 %v202_v19 }
 0x1e6   :  { %v201_v20 = vpop.xlane.xlu0 %200 }
 0x1e7   :  { %v206_v21 = vmul.f32 0.03125, %v201_v20 }
 0x1e9   :  { %v208_v22 = vsub.f32 %v196_v16, %v206_v21 }
 0x1ea   :  { %v204_v23 = vpop.xlane.xlu0 %203 }
 0x1eb   :  { %v207_v24 = vmul.f32 0.03125, %v204_v23  ;;  %v210_v25 = vmul.f32 %v208_v22, %v208_v22 }
 0x1ed   :  { %v209_v26 = vsub.f32 %v197_v18, %v207_v24  ;;  %v212_v27 = vsel %vm198_vm2, %v210_v25, 0.0 }
 0x1ee   :  { %213 = vadd.xlane.f32.xlu1 %v212_v27 }
 0x1ef   :  { %v211_v28 = vmul.f32 %v209_v26, %v209_v26 }
 0x1f1   :  { %v215_v29 = vsel %vm198_vm2, %v211_v28, 0.0 }
 0x1f2   :  { %216 = vadd.xlane.f32.xlu1 %v215_v29 }
 0x27b   :  { %v214_v30 = vpop.xlane.xlu1 %213 }
 0x27c   :  { %v218_v31 = vmul.f32 0.03125, %v214_v30 }
 0x27e   :  { %v220_v32 = vadd.f32 1e-12, %v218_v31 }
 0x27f   :  { %v217_v33 = vpop.xlane.xlu1 %216 }
 0x280   :  { %325 = vrsqrt.f32 %v220_v32  ;;  %v219_v34 = vmul.f32 0.03125, %v217_v33 }
 0x282   :  { %v221_v35 = vadd.f32 1e-12, %v219_v34 }
 0x284   :  { %327 = vrsqrt.f32 %v221_v35 }
 0x28a   :  { %v326_v36 = vpop.eup %325 }
 0x28b   :  { %v224_v38 = vmul.f32 %v326_v36, %v208_v22 }
 0x28d   :  { %v233_v40 = vmul.f32 %v282_v37, %v224_v38 }
 0x28e   :  { %v328_v41 = vpop.eup %327 }
 0x28f   :  { %v225_v42 = vmul.f32 %v328_v41, %v209_v26  ;;  %v242_v43 = vadd.f32 %v283_v39, %v233_v40 }
 0x291   :  { %v234_v44 = vmul.f32 %v282_v37, %v225_v42  ;;  %v286_v45 = vpack.c.bf16 %v242_v43, %v242_v43 }
 0x293   :  { %v243_v46 = vadd.f32 %v283_v39, %v234_v44  ;;  %253 = vst.msk [vmem:[#allocation13] sm:$0xf] %vm252_vm3, %v286_v45 }
 0x295   :  { %v287_v47 = vpack.c.bf16 %v243_v46, %v243_v46 }
 0x297   :  { %254 = vst.msk [vmem:[#allocation13 + $0x4] sm:$0xf] %vm252_vm3, %v287_v47 }
 0x298   :  { %472 = shalt.err (!%p469_p10)
}
 0x299   :  { %s473_s27 = scalar_lea.hbm %s652_s6, 128 }
 0x29a   :  { %p474_p11 = scmp.ne.s32.totalorder %s652_s6, %s473_s27  ;;  %p477_p12 = scmp.lt.u32.totalorder %s473_s27, %s652_s6 }
 0x29c   :  { %p479_p13 = pnand %p477_p12, %p474_p11 }
 0x29e   :  { %482 = shalt.err (!%p479_p13)
}
 0x29f   :  { %266 = dma.vmem_to_hbm [thread:$0]  %s261_s21, 128, %s652_s6, [#allocation4], %s495_s9, %s495_s9, %s496_s10  }
 0x2a0   :  { %491 = dma.done.wait [#allocation4], 128  }
 0x2a1   :  { %492 = vsyncadd [#allocation4], 4294967168 }
 0x2a2   :  { %270 = vsyncpa [#allocation3], 1 }
 0x2a3   :  { %271 = vsyncpa [#allocation6], 1 }
 0x2a4   :  { %272 = vsyncpa [#allocation9], 1 }
 0x2a5   :  { %273 = vsyncpa [#allocation12], 1 }
 0x2a6   :  { %274 = vsyncpa [#allocation4], 1 }

// kernel: _lambda_.27
= control target key start
LH: loop header
LB: loop body
LE: loop exit
PB: predicated region body
PF: predicated region fallthrough
CT: control target
= control target key end

     0   :  { %v16_v0 = vlaneseq  ;;  %v149_v2 = vmov 0   ;;  %s211_s0 = inlined_call_operand.vmem [shape: f32[2,128], index: 0, kind: input, shape index: {}]   ;;  %s212_s1 = inlined_call_operand.vmem [shape: s32[2,1], index: 1, kind: input, shape index: {}]   ;;  %s213_s2 = inlined_call_operand.vmem [shape: s32[2,1], index: 2, kind: input, shape index: {}]   ;;  %s214_s3 = inlined_call_operand.hbm [shape: f32[1,1], index: 3, kind: output, shape index: {}]  }
   0x1   :  { %v19_v1 = vld [vmem:[%s212_s1] sm:$0x3]  ;;  %115 = vset.pattern.permute.xlu1 %v149_v2  ;;  %116 = vset.pattern.permute.xlu0 %v149_v2 }
   0x2   :  { %v58_v3 = vld [vmem:[%s213_s2] sm:$0x3] }
   0x3   :  { %8 = vsyncpa [#allocation3], 0  ;;  %v15_v4 = vld [vmem:[%s211_s0] sm:$0x3]  ;;  %v17_v5 = vand.u32 127, %v16_v0  ;;  %36 = vperm.xlu1 %115, %v19_v1   ;;  %v59_v6 = vadd.s32 3, %v58_v3 }
   0x4   :  { %vm21_vm0 = vcmask 1041408   ;;  %v150_v20 = vmov 0.0   ;;  %s151_s0 = smov [#allocation2]   ;;  %vm94_vm7 = vcmask 0  }
   0x5   :  { %vm18_vm1 = vcmp.lt.s32.totalorder %v17_v5, 3  ;;  %vm55_vm2 = vcmp.ge.s32.totalorder %v17_v5, 3  ;;  %vm56_vm3 = vcmp.lt.s32.totalorder %v17_v5, 8  ;;  %s102_s1 = sshll.u32 %s151_s0, 4  ;;  %s103_s1 = int_to_ptr.vmem [resolvable:$true] %s102_s1 }
   0x6   :  { %v20_v7 = vsel %vm18_vm1, %v15_v4, -1e+30  ;;  %vm182_vm4 = vmand %vm55_vm2, %vm56_vm3  ;;  %s125_s2 = scalar_lea.vmem %s103_s1, 16  ;;  %s129_s18 = scalar_lea.vmem %s103_s1, 32 }
   0x7   :  { %v22_v9 = vsel %vm21_vm0, %v20_v7, -inf  ;;  %v60_v10 = vsel %vm182_vm4, %v15_v4, -1e+30  ;;  %75 = vperm.xlu1 %115, %v59_v6   ;;  %p126_p0 = scmp.ne.s32.totalorder %s103_s1, %s125_s2  ;;  %p130_p1 = scmp.lt.s32.totalorder %s103_s1, %s103_s1 }
   0x8   :  { %23 = vmax.xlane.f32.xlu0 %v22_v9  ;;  %v61_v11 = vsel %vm21_vm0, %v60_v10, -inf  ;;  %p131_p2 = scmp.lt.s32.totalorder %s129_s18, %s125_s2 }
   0xa   :  { %p132_p3 = por %p131_p2, %p130_p1 }
   0xc   :  { %62 = vmax.xlane.f32.xlu0 %v61_v11  ;;  %p133_p4 = pnand %p132_p3, %p126_p0 }
  0x82   :  { %v37_v16 = vpop.permute.xlu1 %36 }
  0x83   :  { %vm38_vm5 = vcmp.eq.s32.totalorder %v37_v16, %v17_v5 }
  0x84   :  { %v110_v21 = vsel %vm38_vm5, 1.0, %v150_v20 }
  0x85   :  { %v41_v23 = vmul.f32 %v110_v21, %v15_v4 }
  0x86   :  { %v76_v19 = vpop.permute.xlu1 %75 }
  0x87   :  { %vm77_vm6 = vcmp.eq.s32.totalorder %v76_v19, %v17_v5  ;;  %v42_v28 = vsel %vm21_vm0, %v41_v23, 0.0 }
  0x88   :  { %v111_v25 = vsel %vm77_vm6, 1.0, %v150_v20 }
  0x89   :  { %v80_v29 = vmul.f32 %v111_v25, %v15_v4 }
  0x8b   :  { %v81_v32 = vsel %vm21_vm0, %v80_v29, 0.0 }
  0x95   :  { %v24_v12 = vpop.xlane.xlu0 %23 }
  0x96   :  { %v25_v13 = vsub.f32 %v20_v7, %v24_v12 }
  0x98   :  { %v26_v14 = vmul.f32 1.442695, %v25_v13 }
  0x99   :  { %v63_v15 = vpop.xlane.xlu0 %62 }
  0x9a   :  { %117 = vpow2.f32 %v26_v14  ;;  %v64_v17 = vsub.f32 %v60_v10, %v63_v15 }
  0x9c   :  { %v65_v18 = vmul.f32 1.442695, %v64_v17 }
  0x9e   :  { %119 = vpow2.f32 %v65_v18 }
  0xa4   :  { %v118_v22 = vpop.eup %117 }
  0xa5   :  { %v28_v24 = vsel %vm18_vm1, %v118_v22, 0.0 }
  0xa6   :  { %v29_v26 = vsel %vm21_vm0, %v28_v24, 0.0 }
  0xa7   :  { %30 = vadd.xlane.f32.xlu0 %v29_v26 }
  0xa8   :  { %v120_v27 = vpop.eup %119 }
  0xa9   :  { %v67_v30 = vsel %vm182_vm4, %v120_v27, 0.0 }
  0xaa   :  { %v68_v31 = vsel %vm21_vm0, %v67_v30, 0.0 }
  0xab   :  { %69 = vadd.xlane.f32.xlu1 %v68_v31  ;;  %43 = vadd.xlane.f32.xlu0 %v42_v28 }
  0xaf   :  { %82 = vadd.xlane.f32.xlu0 %v81_v32 }
 0x134   :  { %v31_v33 = vpop.xlane.xlu0 %30 }
 0x135   :  { %121 = vlog2.f32 %v31_v33 }
 0x138   :  { %v70_v34 = vpop.xlane.xlu1 %69  ;;  %v44_v37 = vpop.xlane.xlu0 %43 }
 0x139   :  { %123 = vlog2.f32 %v70_v34 }
 0x13c   :  { %v83_v45 = vpop.xlane.xlu0 %82 }
 0x13f   :  { %v122_v35 = vpop.eup %121 }
 0x140   :  { %v33_v36 = vmul.f32 0.6931472, %v122_v35 }
 0x142   :  { %v34_v38 = vadd.f32 %v33_v36, %v24_v12 }
 0x143   :  { %v124_v39 = vpop.eup %123 }
 0x144   :  { %v72_v40 = vmul.f32 0.6931472, %v124_v39  ;;  %v45_v41 = vsub.f32 %v34_v38, %v44_v37 }
 0x146   :  { %v46_v42 = vsel %vm21_vm0, %v45_v41, 0.0  ;;  %v73_v43 = vadd.f32 %v72_v40, %v63_v15 }
 0x147   :  { %v47_v44 = vrot.slane %v46_v42, 4 }
 0x148   :  { %v84_v46 = vsub.f32 %v73_v43, %v83_v45 }
 0x149   :  { %v48_v47 = vadd.f32 %v47_v44, %v46_v42 }
 0x14a   :  { %v85_v48 = vsel %vm21_vm0, %v84_v46, 0.0 }
 0x14b   :  { %v49_v49 = vrot.slane %v48_v47, 2  ;;  %v86_v50 = vrot.slane %v85_v48, 4 }
 0x14d   :  { %v50_v51 = vadd.f32 %v49_v49, %v48_v47  ;;  %v87_v52 = vadd.f32 %v86_v50, %v85_v48 }
 0x14f   :  { %v51_v53 = vrot.slane %v50_v51, 1  ;;  %v88_v54 = vrot.slane %v87_v52, 2 }
 0x151   :  { %v89_v55 = vadd.f32 %v88_v54, %v87_v52  ;;  %v52_v57 = vadd.f32 %v51_v53, %v50_v51 }
 0x153   :  { %v90_v56 = vrot.slane %v89_v55, 1  ;;  %v54_v59 = vmul.f32 0.5, %v52_v57 }
 0x155   :  { %v91_v58 = vadd.f32 %v90_v56, %v89_v55 }
 0x157   :  { %v92_v60 = vmul.f32 0.5, %v91_v58 }
 0x159   :  { %v93_v61 = vadd.f32 %v92_v60, %v54_v59 }
 0x15b   :  { %95 = vst.msk [vmem:[#allocation2] sm:$0x1] %vm94_vm7, %v93_v61 }
 0x15c   :  { %136 = shalt.err (!%p133_p4)
}
 0x15d   :  { %s137_s21 = scalar_lea.hbm %s214_s3, 16 }
 0x15e   :  { %p138_p5 = scmp.ne.s32.totalorder %s214_s3, %s137_s21  ;;  %p141_p6 = scmp.lt.u32.totalorder %s137_s21, %s214_s3 }
 0x160   :  { %p143_p7 = pnand %p141_p6, %p138_p5 }
 0x162   :  { %146 = shalt.err (!%p143_p7)
}
 0x163   :  { %105 = dma.vmem_to_hbm [thread:$0]  %s103_s1, 16, %s214_s3, [#allocation3]  }
 0x164   :  { %147 = dma.done.wait [#allocation3], 16  }
 0x165   :  { %148 = vsyncadd [#allocation3], 4294967280 }
 0x166   :  { %109 = vsyncpa [#allocation3], 1 }

</bundles_post_ra>
